<compile_context>
chip_gen: v6e
topology: v6e:2x2x1
jax: 0.10.0
libtpu: 0.0.40
codegen_flags: <defaults>
</compile_context>

<pallas_src>
import math

import jax
import jax.numpy as jnp
from jax.experimental import pallas as pl
from jax.experimental.pallas import tpu as pltpu


_MAX_BATCH_TILE = 512    # rows per grid step (multiple of 8 sublanes)
_EMB_PAD = 128           # label-embedding width padded to one full lane group
_HIDDEN = 512


def _discriminator_kernel(img_ref, emb_ref,
                          w1i_ref, w1e_ref, b1_ref,
                          w2_ref, b2_ref,
                          w3_ref, b3_ref,
                          w4_ref, b4_ref,
                          out_ref):
    """One batch tile of the 4-layer MLP; weights VMEM-resident, b4 in SMEM."""

    def leaky_relu(v):                       # slope 0.2: one vmul + one vmax
        return jnp.maximum(v, 0.2 * v)

    # ---- Layer 1: fused concat via split-W matmul (bf16 MXU, f32 accum) ----
    h = jnp.dot(img_ref[...], w1i_ref[...],
                preferred_element_type=jnp.float32)
    h += jnp.dot(emb_ref[...], w1e_ref[...],
                 preferred_element_type=jnp.float32)
    h = leaky_relu(h + b1_ref[...])                              # (TB, 512) f32

    # ---- Layer 2 ----
    h = jnp.dot(h.astype(jnp.bfloat16), w2_ref[...],
                preferred_element_type=jnp.float32)
    # TODO(synk): nn.Dropout(0.4) is identity in eval mode; training-mode
    # masking (pltpu.prng_seed / prng_random_bits) intentionally omitted.
    h = leaky_relu(h + b2_ref[...])                              # (TB, 512)

    # ---- Layer 3 ----
    h = jnp.dot(h.astype(jnp.bfloat16), w3_ref[...],
                preferred_element_type=jnp.float32)
    h = leaky_relu(h + b3_ref[...])                              # (TB, 512)

    # ---- Layer 4 (512 -> 1): VPU multiply + lane reduce, no N=1 MXU matmul --
    v = jnp.sum(h * w4_ref[...], axis=-1) + b4_ref[0, 0]         # (TB,)
    out_ref[...] = v[None, None, :]                              # lane-dense (1,1,TB)


def _pick_batch_tile(batch):
    """Largest useful batch tile; keeps grid >= 2 for v7x megacore when possible."""
    if batch <= 8:
        return batch                          # single full block (block == array dim)
    if batch >= 2 * _MAX_BATCH_TILE:
        return _MAX_BATCH_TILE
    half = (batch + 1) // 2                   # aim for ~2 grid steps
    return min(_MAX_BATCH_TILE, ((half + 7) // 8) * 8)


@jax.jit
def discriminator_forward(img, labels, kp):
    """img: (B, C, H, W) float32, labels: (B,) int32, kp: kernel params."""
    B = img.shape[0]
    img_flat = img.reshape(B, -1).astype(jnp.bfloat16)           # (B, n_img) bf16
    n_img = img_flat.shape[1]
    n_classes = kp["embedding"].shape[0]

    # Embedding gather stays in the wrapper (tiny table); concat is fused away.
    emb = kp["embedding"][labels].astype(jnp.bfloat16)           # (B, n_classes)
    emb = jnp.pad(emb, ((0, 0), (0, _EMB_PAD - n_classes)))      # (B, 128) bf16

    tb = _pick_batch_tile(B)
    n_tiles = pl.cdiv(B, tb)                 # last block may be partial (no batch pad)

    def resident(shape):                     # weight block pinned across grid
        return pl.BlockSpec(shape, lambda i: (0, 0))

    rows = n_tiles * tb
    flops = 2 * rows * (n_img * _HIDDEN + _EMB_PAD * _HIDDEN
                        + 2 * _HIDDEN * _HIDDEN + _HIDDEN)
    bytes_accessed = (rows * n_img * 2 + rows * _EMB_PAD * 2 + rows * 4   # acts
                      + (n_img + _EMB_PAD) * _HIDDEN * 2                  # w1 bf16
                      + 2 * _HIDDEN * _HIDDEN * 2                         # w2/w3
                      + 4 * _HIDDEN * 4 + 4)                              # w4 + biases

    out = pl.pallas_call(
        _discriminator_kernel,
        out_shape=jax.ShapeDtypeStruct((n_tiles, 1, tb), jnp.float32),
        grid=(n_tiles,),
        in_specs=[
            pl.BlockSpec((tb, n_img), lambda i: (i, 0)),         # img tile (bf16)
            pl.BlockSpec((tb, _EMB_PAD), lambda i: (i, 0)),      # emb tile (bf16)
            resident((n_img, _HIDDEN)),                          # w1_img (bf16)
            resident((_EMB_PAD, _HIDDEN)),                       # w1_emb (bf16)
            resident((1, _HIDDEN)),                              # b1
            resident((_HIDDEN, _HIDDEN)),                        # w2 (bf16)
            resident((1, _HIDDEN)),                              # b2
            resident((_HIDDEN, _HIDDEN)),                        # w3 (bf16)
            resident((1, _HIDDEN)),                              # b3
            resident((1, _HIDDEN)),                              # w4 row
            pl.BlockSpec(memory_space=pltpu.MemorySpace.SMEM),   # b4 scalar
        ],
        out_specs=pl.BlockSpec((1, 1, tb), lambda i: (i, 0, 0)), # lane-dense rows
        compiler_params=pltpu.CompilerParams(
            dimension_semantics=("parallel",)),
        cost_estimate=pl.CostEstimate(flops=flops, transcendentals=0,
                                      bytes_accessed=bytes_accessed),
    )(img_flat, emb,
      kp["w1_img"], kp["w1_emb"], kp["b1"],
      kp["w2"], kp["b2"], kp["w3"], kp["b3"],
      kp["w4_row"], kp["b4"])
    # Drop garbage rows from the (possibly partial) last block.
    return out.reshape(-1)[:B].reshape(B, 1)


def _linear_init(key, fan_in, fan_out):
    """nn.Linear-style init U(-1/sqrt(fan_in), 1/sqrt(fan_in)); W stored (in, out)."""
    k_w, k_b = jax.random.split(key)
    bound = 1.0 / math.sqrt(fan_in)
    w = jax.random.uniform(k_w, (fan_in, fan_out), jnp.float32, -bound, bound)
    b = jax.random.uniform(k_b, (1, fan_out), jnp.float32, -bound, bound)
    return w, b


def make_params(key, n_classes, img_size):
    """f32 parameters in the PyTorch-equivalent layout (x @ W + b)."""
    d_in = n_classes + int(math.prod(img_size))
    keys = jax.random.split(key, 5)
    embedding = jax.random.normal(keys[0], (n_classes, n_classes), jnp.float32)
    w1, b1 = _linear_init(keys[1], d_in, _HIDDEN)
    w2, b2 = _linear_init(keys[2], _HIDDEN, _HIDDEN)
    w3, b3 = _linear_init(keys[3], _HIDDEN, _HIDDEN)
    w4, b4 = _linear_init(keys[4], _HIDDEN, 1)
    return {"embedding": embedding,
            "w1": w1, "b1": b1, "w2": w2, "b2": b2,
            "w3": w3, "b3": b3, "w4": w4, "b4": b4}


def prepare_kernel_params(params, n_img):
    """Split W1, pad the embedding branch to 128 lanes, cast big weights to bf16."""
    w1 = params["w1"]
    n_classes = w1.shape[0] - n_img
    w1_img = w1[:n_img].astype(jnp.bfloat16)                         # (n_img, 512)
    w1_emb = jnp.pad(w1[n_img:],
                     ((0, _EMB_PAD - n_classes), (0, 0))).astype(jnp.bfloat16)
    return {
        "embedding": params["embedding"],                            # (C, C) f32
        "w1_img": w1_img, "w1_emb": w1_emb, "b1": params["b1"],
        "w2": params["w2"].astype(jnp.bfloat16), "b2": params["b2"],
        "w3": params["w3"].astype(jnp.bfloat16), "b3": params["b3"],
        "w4_row": params["w4"].T.astype(jnp.float32),                # (1, 512)
        "b4": params["b4"].reshape(1, 1).astype(jnp.float32),        # (1, 1) SMEM
    }


def _reference_forward(img, labels, params):
    """Plain-JAX mirror of the kernel's bf16-weight / f32-accumulate math."""
    B = img.shape[0]
    d_in = jnp.concatenate(
        [img.reshape(B, -1), params["embedding"][labels]], axis=-1)

    def leaky(v):
        return jnp.maximum(v, 0.2 * v)

    def dot_bf16(x, w):
        return jnp.dot(x.astype(jnp.bfloat16), w.astype(jnp.bfloat16),
                       preferred_element_type=jnp.float32)

    h = leaky(dot_bf16(d_in, params["w1"]) + params["b1"])
    h = leaky(dot_bf16(h, params["w2"]) + params["b2"])
    h = leaky(dot_bf16(h, params["w3"]) + params["b3"])
    return jnp.sum(h * params["w4"].T, axis=-1, keepdims=True) + params["b4"]


if __name__ == "__main__":
    n_classes = 10
    img_size = (1, 16, 16)   # (C, H, W) -> prod = 256 (lane-aligned)
    batch = 2

    key = jax.random.PRNGKey(0)
    k_params, k_img, k_lbl = jax.random.split(key, 3)

    params = make_params(k_params, n_classes, img_size)
    kparams = prepare_kernel_params(params, int(math.prod(img_size)))

    img = jax.random.normal(k_img, (batch,) + img_size, jnp.float32)
    labels = jax.random.randint(k_lbl, (batch,), 0, n_classes, jnp.int32)

    validity = discriminator_forward(img, labels, kparams)
    validity = jax.block_until_ready(validity)

    ref = _reference_forward(img, labels, params)
    assert validity.shape == (batch, 1)
    assert jnp.allclose(validity, ref, atol=5e-3, rtol=5e-3), (
        float(jnp.max(jnp.abs(validity - ref))))

    print("KERNEL_OK")
</pallas_src>

<mosaic_0001>
module attributes {stable_mosaic.version = 11 : i64} {
  func.func @_discriminator_kernel(%arg0: i32, %arg1: memref<2x256xbf16, #tpu.memory_space<vmem>>, %arg2: memref<2x128xbf16, #tpu.memory_space<vmem>>, %arg3: memref<256x512xbf16, #tpu.memory_space<vmem>>, %arg4: memref<128x512xbf16, #tpu.memory_space<vmem>>, %arg5: memref<1x512xf32, #tpu.memory_space<vmem>>, %arg6: memref<512x512xbf16, #tpu.memory_space<vmem>>, %arg7: memref<1x512xf32, #tpu.memory_space<vmem>>, %arg8: memref<512x512xbf16, #tpu.memory_space<vmem>>, %arg9: memref<1x512xf32, #tpu.memory_space<vmem>>, %arg10: memref<1x512xf32, #tpu.memory_space<vmem>>, %arg11: memref<1x1xf32, #tpu.memory_space<smem>>, %arg12: memref<1x1x2xf32, #tpu.memory_space<vmem>>) attributes {dimension_semantics = [#tpu.dimension_semantics<parallel>], iteration_bounds = array<i64: 1>, scalar_prefetch = 0 : i64, scratch_operands = 0 : i64, tpu.core_type = #tpu.core_type<tc>, window_params = [{transform_indices = @transform_0, window_bounds = array<i64: 2, 256>}, {transform_indices = @transform_1, window_bounds = array<i64: 2, 128>}, {pipeline_mode = #tpu.pipeline_mode<synchronous>, transform_indices = @transform_2, window_bounds = array<i64: 256, 512>}, {pipeline_mode = #tpu.pipeline_mode<synchronous>, transform_indices = @transform_3, window_bounds = array<i64: 128, 512>}, {pipeline_mode = #tpu.pipeline_mode<synchronous>, transform_indices = @transform_4, window_bounds = array<i64: 1, 512>}, {pipeline_mode = #tpu.pipeline_mode<synchronous>, transform_indices = @transform_5, window_bounds = array<i64: 512, 512>}, {pipeline_mode = #tpu.pipeline_mode<synchronous>, transform_indices = @transform_6, window_bounds = array<i64: 1, 512>}, {pipeline_mode = #tpu.pipeline_mode<synchronous>, transform_indices = @transform_7, window_bounds = array<i64: 512, 512>}, {pipeline_mode = #tpu.pipeline_mode<synchronous>, transform_indices = @transform_8, window_bounds = array<i64: 1, 512>}, {pipeline_mode = #tpu.pipeline_mode<synchronous>, transform_indices = @transform_9, window_bounds = array<i64: 1, 512>}, {transform_indices = @transform_10, window_bounds = array<i64: 1, 1>}, {transform_indices = @transform_11, window_bounds = array<i64: 1, 1, 2>}]} {
    %c0 = arith.constant 0 : index
    %c0_0 = arith.constant 0 : index
    %0 = vector.load %arg1[%c0, %c0_0] : memref<2x256xbf16, #tpu.memory_space<vmem>>, vector<2x256xbf16>
    %c0_1 = arith.constant 0 : index
    %c0_2 = arith.constant 0 : index
    %1 = vector.load %arg3[%c0_1, %c0_2] : memref<256x512xbf16, #tpu.memory_space<vmem>>, vector<256x512xbf16>
    %cst = arith.constant dense<0.000000e+00> : vector<2x512xf32>
    %2 = tpu.matmul %0, %1, %cst {dimension_numbers = #tpu.dot_dimension_numbers<[1], [0], [0], [1], [0, 0, 1, 1], [], []>} : vector<2x256xbf16>, vector<256x512xbf16>, vector<2x512xf32> -> vector<2x512xf32>
    %c0_3 = arith.constant 0 : index
    %c0_4 = arith.constant 0 : index
    %3 = vector.load %arg2[%c0_3, %c0_4] : memref<2x128xbf16, #tpu.memory_space<vmem>>, vector<2x128xbf16>
    %c0_5 = arith.constant 0 : index
    %c0_6 = arith.constant 0 : index
    %4 = vector.load %arg4[%c0_5, %c0_6] : memref<128x512xbf16, #tpu.memory_space<vmem>>, vector<128x512xbf16>
    %cst_7 = arith.constant dense<0.000000e+00> : vector<2x512xf32>
    %5 = tpu.matmul %3, %4, %cst_7 {dimension_numbers = #tpu.dot_dimension_numbers<[1], [0], [0], [1], [0, 0, 1, 1], [], []>} : vector<2x128xbf16>, vector<128x512xbf16>, vector<2x512xf32> -> vector<2x512xf32>
    %6 = arith.addf %2, %5 : vector<2x512xf32>
    %c0_8 = arith.constant 0 : index
    %c0_9 = arith.constant 0 : index
    %7 = vector.load %arg5[%c0_8, %c0_9] : memref<1x512xf32, #tpu.memory_space<vmem>>, vector<1x512xf32>
    %8 = vector.broadcast %7 : vector<1x512xf32> to vector<2x512xf32>
    %9 = arith.addf %6, %8 : vector<2x512xf32>
    %cst_10 = arith.constant 2.000000e-01 : f32
    %10 = vector.broadcast %cst_10 : f32 to vector<2x512xf32>
    %11 = arith.mulf %10, %9 : vector<2x512xf32>
    %12 = arith.maximumf %9, %11 : vector<2x512xf32>
    %13 = arith.truncf %12 : vector<2x512xf32> to vector<2x512xbf16>
    %c0_11 = arith.constant 0 : index
    %c0_12 = arith.constant 0 : index
    %14 = vector.load %arg6[%c0_11, %c0_12] : memref<512x512xbf16, #tpu.memory_space<vmem>>, vector<512x512xbf16>
    %cst_13 = arith.constant dense<0.000000e+00> : vector<2x512xf32>
    %15 = tpu.matmul %13, %14, %cst_13 {dimension_numbers = #tpu.dot_dimension_numbers<[1], [0], [0], [1], [0, 0, 1, 1], [], []>} : vector<2x512xbf16>, vector<512x512xbf16>, vector<2x512xf32> -> vector<2x512xf32>
    %c0_14 = arith.constant 0 : index
    %c0_15 = arith.constant 0 : index
    %16 = vector.load %arg7[%c0_14, %c0_15] : memref<1x512xf32, #tpu.memory_space<vmem>>, vector<1x512xf32>
    %17 = vector.broadcast %16 : vector<1x512xf32> to vector<2x512xf32>
    %18 = arith.addf %15, %17 : vector<2x512xf32>
    %cst_16 = arith.constant 2.000000e-01 : f32
    %19 = vector.broadcast %cst_16 : f32 to vector<2x512xf32>
    %20 = arith.mulf %19, %18 : vector<2x512xf32>
    %21 = arith.maximumf %18, %20 : vector<2x512xf32>
    %22 = arith.truncf %21 : vector<2x512xf32> to vector<2x512xbf16>
    %c0_17 = arith.constant 0 : index
    %c0_18 = arith.constant 0 : index
    %23 = vector.load %arg8[%c0_17, %c0_18] : memref<512x512xbf16, #tpu.memory_space<vmem>>, vector<512x512xbf16>
    %cst_19 = arith.constant dense<0.000000e+00> : vector<2x512xf32>
    %24 = tpu.matmul %22, %23, %cst_19 {dimension_numbers = #tpu.dot_dimension_numbers<[1], [0], [0], [1], [0, 0, 1, 1], [], []>} : vector<2x512xbf16>, vector<512x512xbf16>, vector<2x512xf32> -> vector<2x512xf32>
    %c0_20 = arith.constant 0 : index
    %c0_21 = arith.constant 0 : index
    %25 = vector.load %arg9[%c0_20, %c0_21] : memref<1x512xf32, #tpu.memory_space<vmem>>, vector<1x512xf32>
    %26 = vector.broadcast %25 : vector<1x512xf32> to vector<2x512xf32>
    %27 = arith.addf %24, %26 : vector<2x512xf32>
    %cst_22 = arith.constant 2.000000e-01 : f32
    %28 = vector.broadcast %cst_22 : f32 to vector<2x512xf32>
    %29 = arith.mulf %28, %27 : vector<2x512xf32>
    %30 = arith.maximumf %27, %29 : vector<2x512xf32>
    %c0_23 = arith.constant 0 : index
    %c0_24 = arith.constant 0 : index
    %31 = vector.load %arg10[%c0_23, %c0_24] : memref<1x512xf32, #tpu.memory_space<vmem>>, vector<1x512xf32>
    %32 = vector.broadcast %31 : vector<1x512xf32> to vector<2x512xf32>
    %33 = arith.mulf %30, %32 : vector<2x512xf32>
    %cst_25 = arith.constant dense<0.000000e+00> : vector<2xf32>
    %34 = vector.multi_reduction <add>, %33, %cst_25 [1] : vector<2x512xf32> to vector<2xf32>
    %c0_26 = arith.constant 0 : index
    %c0_27 = arith.constant 0 : index
    %35 = memref.load %arg11[%c0_26, %c0_27] : memref<1x1xf32, #tpu.memory_space<smem>>
    %36 = vector.broadcast %35 : f32 to vector<2xf32>
    %37 = arith.addf %34, %36 : vector<2xf32>
    %38 = vector.shape_cast %37 : vector<2xf32> to vector<1x1x2xf32>
    %c0_28 = arith.constant 0 : index
    %c0_29 = arith.constant 0 : index
    %c0_30 = arith.constant 0 : index
    %39 = vector.load %arg12[%c0_28, %c0_29, %c0_30] : memref<1x1x2xf32, #tpu.memory_space<vmem>>, vector<1x1x2xf32>
    tpu.vector_store %arg12[%c0_28, %c0_29, %c0_30], %38 {strides = array<i32>} : memref<1x1x2xf32, #tpu.memory_space<vmem>>, vector<1x1x2xf32>,
    return
  }
  func.func @transform_0(%arg0: i32) -> (i32, i32) {
    %c0_i32 = arith.constant 0 : i32
    %c0_i32_0 = arith.constant 0 : i32
    return %arg0, %c0_i32 : i32, i32
  }
  func.func @transform_1(%arg0: i32) -> (i32, i32) {
    %c0_i32 = arith.constant 0 : i32
    %c0_i32_0 = arith.constant 0 : i32
    return %arg0, %c0_i32 : i32, i32
  }
  func.func @transform_2(%arg0: i32) -> (i32, i32) {
    %c0_i32 = arith.constant 0 : i32
    %c0_i32_0 = arith.constant 0 : i32
    %c0_i32_1 = arith.constant 0 : i32
    return %c0_i32, %c0_i32_0 : i32, i32
  }
  func.func @transform_3(%arg0: i32) -> (i32, i32) {
    %c0_i32 = arith.constant 0 : i32
    %c0_i32_0 = arith.constant 0 : i32
    %c0_i32_1 = arith.constant 0 : i32
    return %c0_i32, %c0_i32_0 : i32, i32
  }
  func.func @transform_4(%arg0: i32) -> (i32, i32) {
    %c0_i32 = arith.constant 0 : i32
    %c0_i32_0 = arith.constant 0 : i32
    %c0_i32_1 = arith.constant 0 : i32
    return %c0_i32, %c0_i32_0 : i32, i32
  }
  func.func @transform_5(%arg0: i32) -> (i32, i32) {
    %c0_i32 = arith.constant 0 : i32
    %c0_i32_0 = arith.constant 0 : i32
    %c0_i32_1 = arith.constant 0 : i32
    return %c0_i32, %c0_i32_0 : i32, i32
  }
  func.func @transform_6(%arg0: i32) -> (i32, i32) {
    %c0_i32 = arith.constant 0 : i32
    %c0_i32_0 = arith.constant 0 : i32
    %c0_i32_1 = arith.constant 0 : i32
    return %c0_i32, %c0_i32_0 : i32, i32
  }
  func.func @transform_7(%arg0: i32) -> (i32, i32) {
    %c0_i32 = arith.constant 0 : i32
    %c0_i32_0 = arith.constant 0 : i32
    %c0_i32_1 = arith.constant 0 : i32
    return %c0_i32, %c0_i32_0 : i32, i32
  }
  func.func @transform_8(%arg0: i32) -> (i32, i32) {
    %c0_i32 = arith.constant 0 : i32
    %c0_i32_0 = arith.constant 0 : i32
    %c0_i32_1 = arith.constant 0 : i32
    return %c0_i32, %c0_i32_0 : i32, i32
  }
  func.func @transform_9(%arg0: i32) -> (i32, i32) {
    %c0_i32 = arith.constant 0 : i32
    %c0_i32_0 = arith.constant 0 : i32
    %c0_i32_1 = arith.constant 0 : i32
    return %c0_i32, %c0_i32_0 : i32, i32
  }
  func.func @transform_10(%arg0: i32) -> (i32, i32) {
    %c0_i32 = arith.constant 0 : i32
    %c0_i32_0 = arith.constant 0 : i32
    %c0_i32_1 = arith.constant 0 : i32
    return %c0_i32, %c0_i32_0 : i32, i32
  }
  func.func @transform_11(%arg0: i32) -> (i32, i32, i32) {
    %c0_i32 = arith.constant 0 : i32
    %c0_i32_0 = arith.constant 0 : i32
    %c0_i32_1 = arith.constant 0 : i32
    return %arg0, %c0_i32, %c0_i32_0 : i32, i32, i32
  }
}

</mosaic_0001>

<bundles_post_ra>
// kernel: discriminator_forward.1
= control target key start
LH: loop header
LB: loop body
LE: loop exit
PB: predicated region body
PF: predicated region fallthrough
CT: control target
= control target key end

     0   :  { %17 = vsyncpa [#allocation4], 0  ;;  %s4074_s0 = inlined_call_operand.vmem [shape: bf16[2,256], index: 0, kind: input, shape index: {}]   ;;  %s4075_s1 = inlined_call_operand.vmem [shape: bf16[2,128], index: 1, kind: input, shape index: {}]   ;;  %s4076_s2 = inlined_call_operand.hbm [shape: bf16[256,512], index: 2, kind: input, shape index: {}]   ;;  %s4077_s3 = inlined_call_operand.hbm [shape: bf16[128,512], index: 3, kind: input, shape index: {}]   ;;  %s4078_s4 = inlined_call_operand.vmem [shape: f32[1,512], index: 4, kind: input, shape index: {}]   ;;  %s4079_s5 = inlined_call_operand.hbm [shape: bf16[512,512], index: 5, kind: input, shape index: {}]   ;;  %s4080_s6 = inlined_call_operand.vmem [shape: f32[1,512], index: 6, kind: input, shape index: {}]   ;;  %s4081_s7 = inlined_call_operand.hbm [shape: bf16[512,512], index: 7, kind: input, shape index: {}]   ;;  %s4082_s8 = inlined_call_operand.vmem [shape: f32[1,512], index: 8, kind: input, shape index: {}]   ;;  %s4083_s9 = inlined_call_operand.vmem [shape: f32[1,512], index: 9, kind: input, shape index: {}]   ;;  %s4084_s10 = inlined_call_operand.<no memory space> [shape: f32[1,1], index: 10, kind: input, shape index: {}]   ;;  %s4085_s11 = inlined_call_operand.hbm [shape: f32[1,1,2], index: 11, kind: output, shape index: {}]  }
   0x1   :  { %18 = vsyncpa [#allocation7], 0 }
   0x2   :  { %19 = vsyncpa [#allocation10], 0 }
   0x3   :  { %20 = vsyncpa [#allocation5], 0  ;;  %s3893_s17 = smov [#allocation6]   ;;  %s3894_s19 = smov [#allocation3]  }
   0x4   :  { %s42_s18 = sshll.u32 %s3893_s17, 4  ;;  %s30_s20 = sshll.u32 %s3894_s19, 4  ;;  %s43_s18 = int_to_ptr.vmem [resolvable:$true] %s42_s18  ;;  %s31_s20 = int_to_ptr.vmem [resolvable:$true] %s30_s20 }
   0x5   :  { %s3793_s21 = scalar_lea.vmem %s43_s18, 4096  ;;  %p3798_p1 = scmp.lt.s32.totalorder %s43_s18, %s43_s18 }
   0x6   :  { %p3794_p0 = scmp.ne.s32.totalorder %s43_s18, %s3793_s21  ;;  %p3799_p2 = scmp.lt.s32.totalorder %s3793_s21, %s3793_s21 }
   0x8   :  { %p3800_p3 = por %p3799_p2, %p3798_p1 }
   0xa   :  { %p3801_p4 = pnand %p3800_p3, %p3794_p0 }
   0xc   :  { %3804 = shalt.err (!%p3801_p4)
}
   0xd   :  { %s3895_s22 = smov 256   ;;  %s3896_s23 = smov 16  }
   0xe   :  { %48 = dma.hbm_to_vmem [thread:$0]  %s4077_s3, 4096, %s43_s18, [#allocation7], %s3895_s22, %s3895_s22, %s3896_s23  }
   0xf   :  { %s3813_s26 = scalar_lea.vmem %s31_s20, 8192  ;;  %p3818_p6 = scmp.lt.s32.totalorder %s31_s20, %s31_s20 }
  0x10   :  { %p3814_p5 = scmp.ne.s32.totalorder %s31_s20, %s3813_s26  ;;  %p3819_p7 = scmp.lt.s32.totalorder %s3813_s26, %s3813_s26 }
  0x12   :  { %p3820_p8 = por %p3819_p7, %p3818_p6 }
  0x14   :  { %p3821_p9 = pnand %p3820_p8, %p3814_p5 }
  0x16   :  { %3824 = shalt.err (!%p3821_p9)
}
  0x17   :  { %36 = dma.hbm_to_vmem [thread:$0]  %s4076_s2, 8192, %s31_s20, [#allocation4], %s3895_s22, %s3895_s22, %s3896_s23  }
  0x18   :  { %s3897_s29 = smov [#allocation8]   ;;  %s3898_s12 = smov [#allocation9]  }
  0x19   :  { %s56_s30 = sshll.u32 %s3897_s29, 4  ;;  %s70_s13 = sshll.u32 %s3898_s12, 4  ;;  %s57_s30 = int_to_ptr.vmem [resolvable:$true] %s56_s30  ;;  %s71_s13 = int_to_ptr.vmem [resolvable:$true] %s70_s13 }
  0x1a   :  { %s3833_s3 = scalar_lea.vmem %s57_s30, 16384  ;;  %p3838_p11 = scmp.lt.s32.totalorder %s57_s30, %s57_s30 }
  0x1b   :  { %p3834_p10 = scmp.ne.s32.totalorder %s57_s30, %s3833_s3  ;;  %p3839_p12 = scmp.lt.s32.totalorder %s3833_s3, %s3833_s3 }
  0x1d   :  { %p3840_p13 = por %p3839_p12, %p3838_p11 }
  0x1f   :  { %p3841_p0 = pnand %p3840_p13, %p3834_p10 }
  0x21   :  { %3844 = shalt.err (!%p3841_p0)
}
  0x22   :  { %62 = dma.hbm_to_vmem [thread:$0]  %s4079_s5, 16384, %s57_s30, [#allocation7], %s3895_s22, %s3895_s22, %s3896_s23  }
  0x23   :  { %s3853_s2 = scalar_lea.vmem %s71_s13, 16384  ;;  %p3858_p2 = scmp.lt.s32.totalorder %s71_s13, %s71_s13 }
  0x24   :  { %p3854_p1 = scmp.ne.s32.totalorder %s71_s13, %s3853_s2  ;;  %p3859_p3 = scmp.lt.s32.totalorder %s3853_s2, %s3853_s2 }
  0x26   :  { %p3860_p4 = por %p3859_p3, %p3858_p2 }
  0x28   :  { %p3861_p5 = pnand %p3860_p4, %p3854_p1 }
  0x2a   :  { %3864 = shalt.err (!%p3861_p5)
}
  0x2b   :  { %76 = dma.hbm_to_vmem [thread:$0]  %s4081_s7, 16384, %s71_s13, [#allocation10], %s3895_s22, %s3895_s22, %s3896_s23  }
  0x2c   :  { %3885 = dma.done.wait [#allocation4], 8192  }
  0x2d   :  { %3886 = vsyncadd [#allocation4], 4294959104 }
  0x2e   :  { %3887 = dma.done.wait [#allocation7], 20480  }
  0x2f   :  { %3888 = vsyncadd [#allocation7], 4294946816 }
  0x30   :  { %3889 = dma.done.wait [#allocation10], 16384  }
  0x31   :  { %3890 = vsyncadd [#allocation10], 4294950912  ;;  %v3899_v0 = vmov 0   ;;  %v3257_v1 = vld [vmem:[#allocation6 + $0xe4] ss:$16 sps:$4 sm:$0xff]   ;;  %v448_v63 = vlaneseq  ;;  %vm2855_vm0 = vcmask 1041408  }
  0x32   :  { %386 = vmatprep.mubr.bf16.mxu0 %v3899_v0  ;;  %427 = vmatprep.mubr.bf16.mxu1 %v3899_v0  ;;  %v3259_v2 = vld [vmem:[#allocation6 + $0xec] ss:$16 sps:$4 sm:$0xff]   ;;  %v3261_v3 = vld [vmem:[#allocation6 + $0xe0] ss:$16 sps:$4 sm:$0xff]   ;;  %v3262_v4 = vld [vmem:[#allocation6 + $0xe8] ss:$16 sps:$4 sm:$0xff]  }
  0x33   :  { %354 = vmatprep.subr.bf16.mxu0 %v3257_v1  ;;  %395 = vmatprep.subr.bf16.mxu1 %v3259_v2  ;;  %v3263_v5 = vld [vmem:[#allocation6 + $0xc4] ss:$16 sps:$4 sm:$0xff]   ;;  %v3265_v6 = vld [vmem:[#allocation6 + $0xcc] ss:$16 sps:$4 sm:$0xff]   ;;  %v3267_v7 = vld [vmem:[#allocation6 + $0xc0] ss:$16 sps:$4 sm:$0xff]  }
  0x34   :  { %355 = vmatpush1.bf16.msra.mxu0 %v3261_v3  ;;  %396 = vmatpush1.bf16.msra.mxu1 %v3262_v4  ;;  %v3268_v8 = vld [vmem:[#allocation6 + $0xc8] ss:$16 sps:$4 sm:$0xff]   ;;  %v3269_v9 = vld [vmem:[#allocation6 + $0xa4] ss:$16 sps:$4 sm:$0xff]   ;;  %v3271_v10 = vld [vmem:[#allocation6 + $0xac] ss:$16 sps:$4 sm:$0xff]  }
  0x35   :  { %356 = vmatprep.subr.bf16.mxu0 %v3263_v5  ;;  %397 = vmatprep.subr.bf16.mxu1 %v3265_v6  ;;  %v3273_v11 = vld [vmem:[#allocation6 + $0xa0] ss:$16 sps:$4 sm:$0xff]   ;;  %v3274_v12 = vld [vmem:[#allocation6 + $0xa8] ss:$16 sps:$4 sm:$0xff]   ;;  %v3275_v13 = vld [vmem:[#allocation6 + $0x84] ss:$16 sps:$4 sm:$0xff]  }
  0x36   :  { %v3277_v14 = vld [vmem:[#allocation6 + $0x8c] ss:$16 sps:$4 sm:$0xff]   ;;  %v3279_v15 = vld [vmem:[#allocation6 + $0x80] ss:$16 sps:$4 sm:$0xff]   ;;  %v3280_v16 = vld [vmem:[#allocation6 + $0x88] ss:$16 sps:$4 sm:$0xff]  }
  0x37   :  { %v3281_v17 = vld [vmem:[#allocation6 + $0x64] ss:$16 sps:$4 sm:$0xff]   ;;  %v3283_v18 = vld [vmem:[#allocation6 + $0x6c] ss:$16 sps:$4 sm:$0xff]   ;;  %v3285_v19 = vld [vmem:[#allocation6 + $0x60] ss:$16 sps:$4 sm:$0xff]  }
  0x38   :  { %357 = vmatpush1.bf16.msra.mxu0 %v3267_v7  ;;  %398 = vmatpush1.bf16.msra.mxu1 %v3268_v8  ;;  %v3286_v20 = vld [vmem:[#allocation6 + $0x68] ss:$16 sps:$4 sm:$0xff]   ;;  %v3287_v21 = vld [vmem:[#allocation6 + $0x44] ss:$16 sps:$4 sm:$0xff]   ;;  %v3289_v22 = vld [vmem:[#allocation6 + $0x4c] ss:$16 sps:$4 sm:$0xff]  }
  0x39   :  { %358 = vmatprep.subr.bf16.mxu0 %v3269_v9  ;;  %399 = vmatprep.subr.bf16.mxu1 %v3271_v10  ;;  %v3291_v23 = vld [vmem:[#allocation6 + $0x40] ss:$16 sps:$4 sm:$0xff]   ;;  %v3292_v24 = vld [vmem:[#allocation6 + $0x48] ss:$16 sps:$4 sm:$0xff]   ;;  %v3293_v25 = vld [vmem:[#allocation6 + $0x24] ss:$16 sps:$4 sm:$0xff]  }
  0x3a   :  { %v3295_v26 = vld [vmem:[#allocation6 + $0x2c] ss:$16 sps:$4 sm:$0xff]   ;;  %v3297_v27 = vld [vmem:[#allocation6 + $0x20] ss:$16 sps:$4 sm:$0xff]   ;;  %v3298_v28 = vld [vmem:[#allocation6 + $0x28] ss:$16 sps:$4 sm:$0xff]  }
  0x3b   :  { %v3299_v29 = vld [vmem:[#allocation6 + $0x4] ss:$16 sps:$4 sm:$0xff]   ;;  %v3301_v30 = vld [vmem:[#allocation6 + $0xc] ss:$16 sps:$4 sm:$0xff]   ;;  %v3303_v31 = vld [vmem:[#allocation6] ss:$16 sps:$4 sm:$0xff]  }
  0x3c   :  { %359 = vmatpush1.bf16.msra.mxu0 %v3273_v11  ;;  %400 = vmatpush1.bf16.msra.mxu1 %v3274_v12  ;;  %v3304_v32 = vld [vmem:[#allocation6 + $0x8] ss:$16 sps:$4 sm:$0xff]   ;;  %v3307_v33 = vld [vmem:[#allocation3 + $0xe4] ss:$16 sps:$4 sm:$0xff]   ;;  %v3310_v34 = vld [vmem:[#allocation3 + $0xec] ss:$16 sps:$4 sm:$0xff]  }
  0x3d   :  { %360 = vmatprep.subr.bf16.mxu0 %v3275_v13  ;;  %401 = vmatprep.subr.bf16.mxu1 %v3277_v14  ;;  %v161_v35 = vld [vmem:[%s4075_s1] sm:$0x1]  ;;  %v3308_v37 = vld [vmem:[#allocation3 + $0xe8] ss:$16 sps:$4 sm:$0xff]   ;;  %v3313_v38 = vld [vmem:[#allocation3 + $0xc4] ss:$16 sps:$4 sm:$0xff]  }
  0x3e   :  { %v3305_v36 = vld [vmem:[#allocation3 + $0xe0] ss:$16 sps:$4 sm:$0xff]   ;;  %v3316_v39 = vld [vmem:[#allocation3 + $0xcc] ss:$16 sps:$4 sm:$0xff]   ;;  %v3314_v41 = vld [vmem:[#allocation3 + $0xc8] ss:$16 sps:$4 sm:$0xff]  }
  0x3f   :  { %v3311_v40 = vld [vmem:[#allocation3 + $0xc0] ss:$16 sps:$4 sm:$0xff]   ;;  %v3319_v42 = vld [vmem:[#allocation3 + $0xa4] ss:$16 sps:$4 sm:$0xff]   ;;  %v3322_v43 = vld [vmem:[#allocation3 + $0xac] ss:$16 sps:$4 sm:$0xff]  }
  0x40   :  { %361 = vmatpush1.bf16.msra.mxu0 %v3279_v15  ;;  %402 = vmatpush1.bf16.msra.mxu1 %v3280_v16  ;;  %v3317_v44 = vld [vmem:[#allocation3 + $0xa0] ss:$16 sps:$4 sm:$0xff]   ;;  %v3320_v45 = vld [vmem:[#allocation3 + $0xa8] ss:$16 sps:$4 sm:$0xff]   ;;  %v3325_v46 = vld [vmem:[#allocation3 + $0x84] ss:$16 sps:$4 sm:$0xff]  }
  0x41   :  { %362 = vmatprep.subr.bf16.mxu0 %v3281_v17  ;;  %403 = vmatprep.subr.bf16.mxu1 %v3283_v18  ;;  %v3328_v47 = vld [vmem:[#allocation3 + $0x8c] ss:$16 sps:$4 sm:$0xff]   ;;  %v3323_v48 = vld [vmem:[#allocation3 + $0x80] ss:$16 sps:$4 sm:$0xff]   ;;  %v3326_v49 = vld [vmem:[#allocation3 + $0x88] ss:$16 sps:$4 sm:$0xff]  }
  0x42   :  { %v3331_v50 = vld [vmem:[#allocation3 + $0x64] ss:$16 sps:$4 sm:$0xff]   ;;  %v3334_v51 = vld [vmem:[#allocation3 + $0x6c] ss:$16 sps:$4 sm:$0xff]   ;;  %v3329_v52 = vld [vmem:[#allocation3 + $0x60] ss:$16 sps:$4 sm:$0xff]  }
  0x43   :  { %v3332_v53 = vld [vmem:[#allocation3 + $0x68] ss:$16 sps:$4 sm:$0xff]   ;;  %v3337_v54 = vld [vmem:[#allocation3 + $0x44] ss:$16 sps:$4 sm:$0xff]   ;;  %v3340_v55 = vld [vmem:[#allocation3 + $0x4c] ss:$16 sps:$4 sm:$0xff]  }
  0x44   :  { %363 = vmatpush1.bf16.msra.mxu0 %v3285_v19  ;;  %404 = vmatpush1.bf16.msra.mxu1 %v3286_v20  ;;  %v3335_v56 = vld [vmem:[#allocation3 + $0x40] ss:$16 sps:$4 sm:$0xff]   ;;  %v3338_v57 = vld [vmem:[#allocation3 + $0x48] ss:$16 sps:$4 sm:$0xff]   ;;  %v3343_v58 = vld [vmem:[#allocation3 + $0x24] ss:$16 sps:$4 sm:$0xff]  }
  0x45   :  { %364 = vmatprep.subr.bf16.mxu0 %v3287_v21  ;;  %405 = vmatprep.subr.bf16.mxu1 %v3289_v22  ;;  %v3346_v59 = vld [vmem:[#allocation3 + $0x2c] ss:$16 sps:$4 sm:$0xff]   ;;  %v3341_v60 = vld [vmem:[#allocation3 + $0x20] ss:$16 sps:$4 sm:$0xff]   ;;  %v3900_v61 = vmov 1966171168  }
  0x46   :  { %v446_v62 = vunpack.c.l.s4 %v3900_v61  ;;  %v3344_v0 = vld [vmem:[#allocation3 + $0x28] ss:$16 sps:$4 sm:$0xff]   ;;  %v3349_v1 = vld [vmem:[#allocation3 + $0x4] ss:$16 sps:$4 sm:$0xff]   ;;  %v3352_v2 = vld [vmem:[#allocation3 + $0xc] ss:$16 sps:$4 sm:$0xff]  }
  0x47   :  { %v3347_v3 = vld [vmem:[#allocation3] ss:$16 sps:$4 sm:$0xff]   ;;  %v3990_v5 = vshrl.u32 %v448_v63, 7  ;;  %v3350_v6 = vld [vmem:[#allocation3 + $0x8] ss:$16 sps:$4 sm:$0xff]   ;;  %s3901_s24 = smov [#allocation11]  }
  0x48   :  { %365 = vmatpush1.bf16.msra.mxu0 %v3291_v23  ;;  %406 = vmatpush1.bf16.msra.mxu1 %v3292_v24  ;;  %v447_v4 = vunpack.c.0.s8 %v446_v62  ;;  %v3355_v7 = vld [vmem:[#allocation3 + $0x1e4] ss:$16 sps:$4 sm:$0xff]   ;;  %v3358_v8 = vld [vmem:[#allocation3 + $0x1ec] ss:$16 sps:$4 sm:$0xff]   ;;  %v3353_v9 = vld [vmem:[#allocation3 + $0x1e0] ss:$16 sps:$4 sm:$0xff]  }
  0x49   :  { %366 = vmatprep.subr.bf16.mxu0 %v3293_v25  ;;  %407 = vmatprep.subr.bf16.mxu1 %v3295_v26  ;;  %v3356_v10 = vld [vmem:[#allocation3 + $0x1e8] ss:$16 sps:$4 sm:$0xff]   ;;  %v3361_v11 = vld [vmem:[#allocation3 + $0x1c4] ss:$16 sps:$4 sm:$0xff]   ;;  %v3364_v13 = vld [vmem:[#allocation3 + $0x1cc] ss:$16 sps:$4 sm:$0xff]  }
  0x4a   :  { %v3993_v12 = vsub.s32 %v447_v4, %v3990_v5  ;;  %v2927_v14 = vld.sshfl [vmem:[%s4074_s0] sm:$0x11 pattern:$0x75316420]  ;;  %v3362_v17 = vld [vmem:[#allocation3 + $0x1c8] ss:$16 sps:$4 sm:$0xff]  }
  0x4b   :  { %v444_v15 = vcombine.high %v2927_v14, %v2927_v14  ;;  %v3359_v16 = vld [vmem:[#allocation3 + $0x1c0] ss:$16 sps:$4 sm:$0xff]   ;;  %v3367_v18 = vld [vmem:[#allocation3 + $0x1a4] ss:$16 sps:$4 sm:$0xff]   ;;  %v3370_v19 = vld [vmem:[#allocation3 + $0x1ac] ss:$16 sps:$4 sm:$0xff]  }
  0x4c   :  { %367 = vmatpush1.bf16.msra.mxu0 %v3297_v27  ;;  %408 = vmatpush1.bf16.msra.mxu1 %v3298_v28  ;;  %v3365_v21 = vld [vmem:[#allocation3 + $0x1a0] ss:$16 sps:$4 sm:$0xff]   ;;  %v3368_v22 = vld [vmem:[#allocation3 + $0x1a8] ss:$16 sps:$4 sm:$0xff]   ;;  %v3373_v23 = vld [vmem:[#allocation3 + $0x184] ss:$16 sps:$4 sm:$0xff]  }
  0x4d   :  { %368 = vmatprep.subr.bf16.mxu0 %v3299_v29  ;;  %409 = vmatprep.subr.bf16.mxu1 %v3301_v30  ;;  %v458_v20 = vrot.slane %v444_v15, %v3993_v12  ;;  %v3376_v24 = vld [vmem:[#allocation3 + $0x18c] ss:$16 sps:$4 sm:$0xff]   ;;  %v3371_v25 = vld [vmem:[#allocation3 + $0x180] ss:$16 sps:$4 sm:$0xff]   ;;  %v3374_v26 = vld [vmem:[#allocation3 + $0x188] ss:$16 sps:$4 sm:$0xff]  }
  0x4e   :  { %v3379_v27 = vld [vmem:[#allocation3 + $0x164] ss:$16 sps:$4 sm:$0xff]   ;;  %v3382_v28 = vld [vmem:[#allocation3 + $0x16c] ss:$16 sps:$4 sm:$0xff]   ;;  %v3377_v29 = vld [vmem:[#allocation3 + $0x160] ss:$16 sps:$4 sm:$0xff]  }
  0x4f   :  { %v3380_v30 = vld [vmem:[#allocation3 + $0x168] ss:$16 sps:$4 sm:$0xff]   ;;  %v3430_v61 = vld [vmem:[#allocation8 + $0x264] ss:$16 sps:$4 sm:$0xff]   ;;  %v3425_v62 = vld [vmem:[#allocation8 + $0x60] ss:$16 sps:$4 sm:$0xff]  }
  0x50   :  { %369 = vmatpush1.bf16.msra.mxu0 %v3303_v31  ;;  %410 = vmatpush1.bf16.msra.mxu1 %v3304_v32  ;;  %v3385_v31 = vld [vmem:[#allocation3 + $0x144] ss:$16 sps:$4 sm:$0xff]   ;;  %v3388_v32 = vld [vmem:[#allocation3 + $0x14c] ss:$16 sps:$4 sm:$0xff]   ;;  %v3434_v4 = vld [vmem:[#allocation8 + $0x240] ss:$16 sps:$4 sm:$0xff]  }
  0x51   :  { %781 = vmatprep.subr.bf16.mxu0 %v3307_v33  ;;  %822 = vmatprep.subr.bf16.mxu1 %v3310_v34  ;;  %v3383_v33 = vld [vmem:[#allocation3 + $0x140] ss:$16 sps:$4 sm:$0xff]   ;;  %v3386_v34 = vld [vmem:[#allocation3 + $0x148] ss:$16 sps:$4 sm:$0xff]   ;;  %v3454_v15 = vld [vmem:[#allocation8 + $0x3e4] ss:$16 sps:$4 sm:$0xff]  }
  0x52   :  { %s2884_s25 = sshll.u32 %s3901_s24, 4  ;;  %vm2876_vm1 = vcmask 8192   ;;  %s2885_s25 = int_to_ptr.vmem [resolvable:$true] %s2884_s25 }
  0x53   :  { %387 = vmatmul.mubr.bf16.vlgmr.msra.gmra.mxu0 %v161_v35  ;;  %428 = vmatmul.mubr.bf16.vlgmr.msra.gmra.mxu1 %v161_v35  ;;  %v3391_v35 = vld [vmem:[#allocation3 + $0x124] ss:$16 sps:$4 sm:$0xff]   ;;  %s3865_s26 = scalar_lea.vmem %s2885_s25, 16  ;;  %s3869_s27 = scalar_lea.vmem %s2885_s25, 32 }
  0x54   :  { %782 = vmatpush1.bf16.msra.mxu0 %v3305_v36  ;;  %823 = vmatpush1.bf16.msra.mxu1 %v3308_v37  ;;  %v3394_v36 = vld [vmem:[#allocation3 + $0x12c] ss:$16 sps:$4 sm:$0xff]   ;;  %v3389_v37 = vld [vmem:[#allocation3 + $0x120] ss:$16 sps:$4 sm:$0xff]   ;;  %p3866_p6 = scmp.ne.s32.totalorder %s2885_s25, %s3865_s26  ;;  %p3870_p7 = scmp.lt.s32.totalorder %s2885_s25, %s2885_s25 }
  0x55   :  { %783 = vmatprep.subr.bf16.mxu0 %v3313_v38  ;;  %824 = vmatprep.subr.bf16.mxu1 %v3316_v39  ;;  %v3392_v38 = vld [vmem:[#allocation3 + $0x128] ss:$16 sps:$4 sm:$0xff]   ;;  %v3397_v39 = vld [vmem:[#allocation3 + $0x104] ss:$16 sps:$4 sm:$0xff]   ;;  %p3871_p8 = scmp.lt.s32.totalorder %s3869_s27, %s3865_s26 }
  0x56   :  { %813 = vmatprep.mubr.bf16.mxu0 %v458_v20  ;;  %854 = vmatprep.mubr.bf16.mxu1 %v458_v20  ;;  %v3455_v20 = vld [vmem:[#allocation8 + $0x1c0] ss:$16 sps:$4 sm:$0xff]  }
  0x57   :  { %p3872_p9 = por %p3871_p8, %p3870_p7 }
  0x58   :  { %784 = vmatpush1.bf16.msra.mxu0 %v3311_v40  ;;  %825 = vmatpush1.bf16.msra.mxu1 %v3314_v41  ;;  %v3400_v40 = vld [vmem:[#allocation3 + $0x10c] ss:$16 sps:$4 sm:$0xff]   ;;  %v3395_v41 = vld [vmem:[#allocation3 + $0x100] ss:$16 sps:$4 sm:$0xff]  }
  0x59   :  { %785 = vmatprep.subr.bf16.mxu0 %v3319_v42  ;;  %826 = vmatprep.subr.bf16.mxu1 %v3322_v43  ;;  %v3398_v42 = vld [vmem:[#allocation3 + $0x108] ss:$16 sps:$4 sm:$0xff]   ;;  %v451_v43 = vrot.slane %v2927_v14, %v3993_v12  ;;  %v3443_v12 = vld [vmem:[#allocation8] ss:$16 sps:$4 sm:$0xff]   ;;  %v3451_v14 = vld [vmem:[#allocation8 + $0x1e4] ss:$16 sps:$4 sm:$0xff]   ;;  %p3873_p10 = pnand %p3872_p9, %p3866_p6 }
  0x5c   :  { %786 = vmatpush1.bf16.msra.mxu0 %v3317_v44  ;;  %827 = vmatpush1.bf16.msra.mxu1 %v3320_v45  ;;  %v3401_v44 = vld [vmem:[#allocation8 + $0xe0] ss:$16 sps:$4 sm:$0xff]   ;;  %v3403_v45 = vld [vmem:[#allocation8 + $0xe4] ss:$16 sps:$4 sm:$0xff]  }
  0x5d   :  { %787 = vmatprep.subr.bf16.mxu0 %v3325_v46  ;;  %828 = vmatprep.subr.bf16.mxu1 %v3328_v47  ;;  %v3404_v46 = vld [vmem:[#allocation8 + $0x2e0] ss:$16 sps:$4 sm:$0xff]   ;;  %v3406_v47 = vld [vmem:[#allocation8 + $0x2e4] ss:$16 sps:$4 sm:$0xff]  }
  0x60   :  { %788 = vmatpush1.bf16.msra.mxu0 %v3323_v48  ;;  %829 = vmatpush1.bf16.msra.mxu1 %v3326_v49  ;;  %v3409_v48 = vld [vmem:[#allocation8 + $0xc4] ss:$16 sps:$4 sm:$0xff]  }
  0x61   :  { %789 = vmatprep.subr.bf16.mxu0 %v3331_v50  ;;  %830 = vmatprep.subr.bf16.mxu1 %v3334_v51  ;;  %v3412_v49 = vld [vmem:[#allocation8 + $0x2c4] ss:$16 sps:$4 sm:$0xff]   ;;  %v3407_v50 = vld [vmem:[#allocation8 + $0xc0] ss:$16 sps:$4 sm:$0xff]  }
  0x62   :  { %v3410_v51 = vld [vmem:[#allocation8 + $0x2c0] ss:$16 sps:$4 sm:$0xff]  }
  0x64   :  { %790 = vmatpush1.bf16.msra.mxu0 %v3329_v52  ;;  %831 = vmatpush1.bf16.msra.mxu1 %v3332_v53  ;;  %v3415_v52 = vld [vmem:[#allocation8 + $0xa4] ss:$16 sps:$4 sm:$0xff]  }
  0x65   :  { %791 = vmatprep.subr.bf16.mxu0 %v3337_v54  ;;  %832 = vmatprep.subr.bf16.mxu1 %v3340_v55  ;;  %v3418_v53 = vld [vmem:[#allocation8 + $0x2a4] ss:$16 sps:$4 sm:$0xff]   ;;  %v3413_v54 = vld [vmem:[#allocation8 + $0xa0] ss:$16 sps:$4 sm:$0xff]  }
  0x66   :  { %v3416_v55 = vld [vmem:[#allocation8 + $0x2a0] ss:$16 sps:$4 sm:$0xff]  }
  0x68   :  { %792 = vmatpush1.bf16.msra.mxu0 %v3335_v56  ;;  %833 = vmatpush1.bf16.msra.mxu1 %v3338_v57  ;;  %v3421_v56 = vld [vmem:[#allocation8 + $0x84] ss:$16 sps:$4 sm:$0xff]  }
  0x69   :  { %793 = vmatprep.subr.bf16.mxu0 %v3343_v58  ;;  %834 = vmatprep.subr.bf16.mxu1 %v3346_v59  ;;  %v3424_v57 = vld [vmem:[#allocation8 + $0x284] ss:$16 sps:$4 sm:$0xff]   ;;  %v3419_v58 = vld [vmem:[#allocation8 + $0x80] ss:$16 sps:$4 sm:$0xff]  }
  0x6a   :  { %v3422_v59 = vld [vmem:[#allocation8 + $0x280] ss:$16 sps:$4 sm:$0xff]  }
  0x6c   :  { %794 = vmatpush1.bf16.msra.mxu0 %v3341_v60  ;;  %835 = vmatpush1.bf16.msra.mxu1 %v3344_v0  ;;  %v3427_v60 = vld [vmem:[#allocation8 + $0x64] ss:$16 sps:$4 sm:$0xff]   ;;  %v3428_v0 = vld [vmem:[#allocation8 + $0x260] ss:$16 sps:$4 sm:$0xff]  }
  0x6d   :  { %795 = vmatprep.subr.bf16.mxu0 %v3349_v1  ;;  %836 = vmatprep.subr.bf16.mxu1 %v3352_v2  ;;  %v3433_v1 = vld [vmem:[#allocation8 + $0x44] ss:$16 sps:$4 sm:$0xff]   ;;  %v3431_v2 = vld [vmem:[#allocation8 + $0x40] ss:$16 sps:$4 sm:$0xff]  }
  0x70   :  { %796 = vmatpush1.bf16.msra.mxu0 %v3347_v3  ;;  %837 = vmatpush1.bf16.msra.mxu1 %v3350_v6  ;;  %v3436_v3 = vld [vmem:[#allocation8 + $0x244] ss:$16 sps:$4 sm:$0xff]  }
  0x71   :  { %797 = vmatprep.subr.bf16.mxu0 %v3355_v7  ;;  %838 = vmatprep.subr.bf16.mxu1 %v3358_v8  ;;  %v3439_v6 = vld [vmem:[#allocation8 + $0x24] ss:$16 sps:$4 sm:$0xff]   ;;  %v3437_v8 = vld [vmem:[#allocation8 + $0x20] ss:$16 sps:$4 sm:$0xff]  }
  0x72   :  { %v3442_v7 = vld [vmem:[#allocation8 + $0x224] ss:$16 sps:$4 sm:$0xff]  }
  0x74   :  { %798 = vmatpush2.bf16.msra.mxu0 %v3353_v9  ;;  %839 = vmatpush2.bf16.msra.mxu1 %v3356_v10  ;;  %v3440_v9 = vld [vmem:[#allocation8 + $0x220] ss:$16 sps:$4 sm:$0xff]   ;;  %v3445_v10 = vld [vmem:[#allocation8 + $0x4] ss:$16 sps:$4 sm:$0xff]  }
  0x75   :  { %799 = vmatprep.subr.bf16.mxu0 %v3361_v11  ;;  %840 = vmatprep.subr.bf16.mxu1 %v3364_v13  ;;  %v3448_v11 = vld [vmem:[#allocation8 + $0x204] ss:$16 sps:$4 sm:$0xff]   ;;  %v3446_v13 = vld [vmem:[#allocation8 + $0x200] ss:$16 sps:$4 sm:$0xff]  }
  0x78   :  { %800 = vmatpush2.bf16.msra.mxu0 %v3359_v16  ;;  %841 = vmatpush2.bf16.msra.mxu1 %v3362_v17  ;;  %v3449_v16 = vld [vmem:[#allocation8 + $0x1e0] ss:$16 sps:$4 sm:$0xff]  }
  0x79   :  { %801 = vmatprep.subr.bf16.mxu0 %v3367_v18  ;;  %842 = vmatprep.subr.bf16.mxu1 %v3370_v19  ;;  %v3452_v17 = vld [vmem:[#allocation8 + $0x3e0] ss:$16 sps:$4 sm:$0xff]   ;;  %v3457_v18 = vld [vmem:[#allocation8 + $0x1c4] ss:$16 sps:$4 sm:$0xff]  }
  0x7a   :  { %v3460_v19 = vld [vmem:[#allocation8 + $0x3c4] ss:$16 sps:$4 sm:$0xff]  }
  0x7c   :  { %802 = vmatpush2.bf16.msra.mxu0 %v3365_v21  ;;  %843 = vmatpush2.bf16.msra.mxu1 %v3368_v22  ;;  %v3458_v21 = vld [vmem:[#allocation8 + $0x3c0] ss:$16 sps:$4 sm:$0xff]   ;;  %v3463_v22 = vld [vmem:[#allocation8 + $0x1a4] ss:$16 sps:$4 sm:$0xff]  }
  0x7d   :  { %803 = vmatprep.subr.bf16.mxu0 %v3373_v23  ;;  %844 = vmatprep.subr.bf16.mxu1 %v3376_v24  ;;  %v3466_v23 = vld [vmem:[#allocation8 + $0x3a4] ss:$16 sps:$4 sm:$0xff]   ;;  %v3461_v24 = vld [vmem:[#allocation8 + $0x1a0] ss:$16 sps:$4 sm:$0xff]  }
  0x80   :  { %804 = vmatpush2.bf16.msra.mxu0 %v3371_v25  ;;  %845 = vmatpush2.bf16.msra.mxu1 %v3374_v26  ;;  %v3464_v25 = vld [vmem:[#allocation8 + $0x3a0] ss:$16 sps:$4 sm:$0xff]   ;;  %v3469_v26 = vld [vmem:[#allocation8 + $0x184] ss:$16 sps:$4 sm:$0xff]  }
  0x81   :  { %805 = vmatprep.subr.bf16.mxu0 %v3379_v27  ;;  %846 = vmatprep.subr.bf16.mxu1 %v3382_v28  ;;  %v3472_v27 = vld [vmem:[#allocation8 + $0x384] ss:$16 sps:$4 sm:$0xff]   ;;  %v3467_v28 = vld [vmem:[#allocation8 + $0x180] ss:$16 sps:$4 sm:$0xff]  }
  0x84   :  { %806 = vmatpush2.bf16.msra.mxu0 %v3377_v29  ;;  %847 = vmatpush2.bf16.msra.mxu1 %v3380_v30  ;;  %v3470_v29 = vld [vmem:[#allocation8 + $0x380] ss:$16 sps:$4 sm:$0xff]   ;;  %v3475_v30 = vld [vmem:[#allocation8 + $0x164] ss:$16 sps:$4 sm:$0xff]  }
  0x85   :  { %807 = vmatprep.subr.bf16.mxu0 %v3385_v31  ;;  %848 = vmatprep.subr.bf16.mxu1 %v3388_v32  ;;  %v3478_v31 = vld [vmem:[#allocation8 + $0x364] ss:$16 sps:$4 sm:$0xff]   ;;  %v3473_v32 = vld [vmem:[#allocation8 + $0x160] ss:$16 sps:$4 sm:$0xff]  }
  0x88   :  { %808 = vmatpush2.bf16.msra.mxu0 %v3383_v33  ;;  %849 = vmatpush2.bf16.msra.mxu1 %v3386_v34  ;;  %v3476_v33 = vld [vmem:[#allocation8 + $0x360] ss:$16 sps:$4 sm:$0xff]   ;;  %v3481_v34 = vld [vmem:[#allocation8 + $0x144] ss:$16 sps:$4 sm:$0xff]  }
  0x89   :  { %809 = vmatprep.subr.bf16.mxu0 %v3391_v35  ;;  %850 = vmatprep.subr.bf16.mxu1 %v3394_v36  ;;  %v3484_v35 = vld [vmem:[#allocation8 + $0x344] ss:$16 sps:$4 sm:$0xff]   ;;  %v3479_v36 = vld [vmem:[#allocation8 + $0x140] ss:$16 sps:$4 sm:$0xff]  }
  0x8c   :  { %810 = vmatpush2.bf16.msra.mxu0 %v3389_v37  ;;  %851 = vmatpush2.bf16.msra.mxu1 %v3392_v38  ;;  %v3482_v37 = vld [vmem:[#allocation8 + $0x340] ss:$16 sps:$4 sm:$0xff]   ;;  %v3487_v38 = vld [vmem:[#allocation8 + $0x124] ss:$16 sps:$4 sm:$0xff]  }
  0x8d   :  { %811 = vmatprep.subr.bf16.mxu0 %v3397_v39  ;;  %852 = vmatprep.subr.bf16.mxu1 %v3400_v40  ;;  %v3490_v39 = vld [vmem:[#allocation8 + $0x324] ss:$16 sps:$4 sm:$0xff]   ;;  %v3485_v40 = vld [vmem:[#allocation8 + $0x120] ss:$16 sps:$4 sm:$0xff]  }
  0x90   :  { %812 = vmatpush2.bf16.msra.mxu0 %v3395_v41  ;;  %853 = vmatpush2.bf16.msra.mxu1 %v3398_v42  ;;  %v3488_v41 = vld [vmem:[#allocation8 + $0x320] ss:$16 sps:$4 sm:$0xff]   ;;  %v3493_v42 = vld [vmem:[#allocation8 + $0x104] ss:$16 sps:$4 sm:$0xff]  }
  0x91   :  { %1691 = vmatprep.subr.bf16.mxu0 %v3403_v45  ;;  %1732 = vmatprep.subr.bf16.mxu1 %v3406_v47  ;;  %v3494_v45 = vld [vmem:[#allocation8 + $0x300] ss:$16 sps:$4 sm:$0xff]   ;;  %v3502_v47 = vld [vmem:[#allocation8 + $0x2ec] ss:$16 sps:$4 sm:$0xff]  }
  0x93   :  { %814 = vmatmul.mubr.bf16.vlgmr.msra.gmra.mxu0 %v451_v43  ;;  %855 = vmatmul.mubr.bf16.vlgmr.msra.gmra.mxu1 %v451_v43  ;;  %v3496_v43 = vld [vmem:[#allocation8 + $0x304] ss:$16 sps:$4 sm:$0xff]  }
  0x94   :  { %1692 = vmatpush1.bf16.msra.mxu0 %v3401_v44  ;;  %1733 = vmatpush1.bf16.msra.mxu1 %v3404_v46  ;;  %v3491_v44 = vld [vmem:[#allocation8 + $0x100] ss:$16 sps:$4 sm:$0xff]   ;;  %v3499_v46 = vld [vmem:[#allocation8 + $0xec] ss:$16 sps:$4 sm:$0xff]  }
  0x95   :  { %1693 = vmatprep.subr.bf16.mxu0 %v3409_v48  ;;  %1734 = vmatprep.subr.bf16.mxu1 %v3412_v49 }
  0x98   :  { %1694 = vmatpush1.bf16.msra.mxu0 %v3407_v50  ;;  %1735 = vmatpush1.bf16.msra.mxu1 %v3410_v51 }
  0x99   :  { %1695 = vmatprep.subr.bf16.mxu0 %v3415_v52  ;;  %1736 = vmatprep.subr.bf16.mxu1 %v3418_v53 }
  0x9c   :  { %1696 = vmatpush1.bf16.msra.mxu0 %v3413_v54  ;;  %1737 = vmatpush1.bf16.msra.mxu1 %v3416_v55 }
  0x9d   :  { %1697 = vmatprep.subr.bf16.mxu0 %v3421_v56  ;;  %1738 = vmatprep.subr.bf16.mxu1 %v3424_v57  ;;  %v4001_v56 = vsub.s32 0, %v3990_v5  ;;  %v4004_v57 = vsub.s32 2, %v3990_v5 }
  0xa0   :  { %1698 = vmatpush1.bf16.msra.mxu0 %v3419_v58  ;;  %1739 = vmatpush1.bf16.msra.mxu1 %v3422_v59  ;;  %v863_v58 = vld [vmem:[%s4078_s4] sm:$0xf]  ;;  %v4010_v59 = vsub.s32 1, %v3990_v5 }
  0xa1   :  { %1699 = vmatprep.subr.bf16.mxu0 %v3427_v60  ;;  %1740 = vmatprep.subr.bf16.mxu1 %v3430_v61  ;;  %v4013_v60 = vsub.s32 3, %v3990_v5  ;;  %v868_v61 = vrot.slane %v863_v58, %v4001_v56 }
  0xa4   :  { %1700 = vmatpush1.bf16.msra.mxu0 %v3425_v62  ;;  %1741 = vmatpush1.bf16.msra.mxu1 %v3428_v0  ;;  %v876_v62 = vrot.slane %v863_v58, %v4004_v57 }
  0xa5   :  { %1701 = vmatprep.subr.bf16.mxu0 %v3433_v1  ;;  %1742 = vmatprep.subr.bf16.mxu1 %v3436_v3 }
  0xa8   :  { %1702 = vmatpush1.bf16.msra.mxu0 %v3431_v2  ;;  %1743 = vmatpush1.bf16.msra.mxu1 %v3434_v4  ;;  %v872_v4 = vrot.slane %v863_v58, %v4010_v59 }
  0xa9   :  { %1703 = vmatprep.subr.bf16.mxu0 %v3439_v6  ;;  %1744 = vmatprep.subr.bf16.mxu1 %v3442_v7  ;;  %v880_v6 = vrot.slane %v863_v58, %v4013_v60  ;;  %v3536_v58 = vld [vmem:[#allocation8 + $0x228] ss:$16 sps:$4 sm:$0xff]  }
  0xac   :  { %1704 = vmatpush1.bf16.msra.mxu0 %v3437_v8  ;;  %1745 = vmatpush1.bf16.msra.mxu1 %v3440_v9 }
  0xad   :  { %1705 = vmatprep.subr.bf16.mxu0 %v3445_v10  ;;  %1746 = vmatprep.subr.bf16.mxu1 %v3448_v11 }
  0xb0   :  { %1706 = vmatpush1.bf16.msra.mxu0 %v3443_v12  ;;  %1747 = vmatpush1.bf16.msra.mxu1 %v3446_v13 }
  0xb1   :  { %1707 = vmatprep.subr.bf16.mxu0 %v3451_v14  ;;  %1748 = vmatprep.subr.bf16.mxu1 %v3454_v15 }
  0xb4   :  { %1708 = vmatpush2.bf16.msra.mxu0 %v3449_v16  ;;  %1749 = vmatpush2.bf16.msra.mxu1 %v3452_v17 }
  0xb5   :  { %1709 = vmatprep.subr.bf16.mxu0 %v3457_v18  ;;  %1750 = vmatprep.subr.bf16.mxu1 %v3460_v19 }
  0xb8   :  { %1710 = vmatpush2.bf16.msra.mxu0 %v3455_v20  ;;  %1751 = vmatpush2.bf16.msra.mxu1 %v3458_v21 }
  0xb9   :  { %1711 = vmatprep.subr.bf16.mxu0 %v3463_v22  ;;  %1752 = vmatprep.subr.bf16.mxu1 %v3466_v23 }
  0xbc   :  { %1712 = vmatpush2.bf16.msra.mxu0 %v3461_v24  ;;  %1753 = vmatpush2.bf16.msra.mxu1 %v3464_v25 }
  0xbd   :  { %1713 = vmatprep.subr.bf16.mxu0 %v3469_v26  ;;  %1754 = vmatprep.subr.bf16.mxu1 %v3472_v27 }
  0xc0   :  { %1714 = vmatpush2.bf16.msra.mxu0 %v3467_v28  ;;  %1755 = vmatpush2.bf16.msra.mxu1 %v3470_v29  ;;  %v3497_v29 = vld [vmem:[#allocation8 + $0xe8] ss:$16 sps:$4 sm:$0xff]  }
  0xc1   :  { %1715 = vmatprep.subr.bf16.mxu0 %v3475_v30  ;;  %1756 = vmatprep.subr.bf16.mxu1 %v3478_v31  ;;  %v3500_v30 = vld [vmem:[#allocation8 + $0x2e8] ss:$16 sps:$4 sm:$0xff]  }
  0xc4   :  { %1716 = vmatpush2.bf16.msra.mxu0 %v3473_v32  ;;  %1757 = vmatpush2.bf16.msra.mxu1 %v3476_v33  ;;  %v3505_v33 = vld [vmem:[#allocation8 + $0xcc] ss:$16 sps:$4 sm:$0xff]  }
  0xc5   :  { %1717 = vmatprep.subr.bf16.mxu0 %v3481_v34  ;;  %1758 = vmatprep.subr.bf16.mxu1 %v3484_v35  ;;  %v3508_v34 = vld [vmem:[#allocation8 + $0x2cc] ss:$16 sps:$4 sm:$0xff]   ;;  %v3503_v35 = vld [vmem:[#allocation8 + $0xc8] ss:$16 sps:$4 sm:$0xff]  }
  0xc8   :  { %1718 = vmatpush2.bf16.msra.mxu0 %v3479_v36  ;;  %1759 = vmatpush2.bf16.msra.mxu1 %v3482_v37  ;;  %v3506_v36 = vld [vmem:[#allocation8 + $0x2c8] ss:$16 sps:$4 sm:$0xff]   ;;  %v3511_v37 = vld [vmem:[#allocation8 + $0xac] ss:$16 sps:$4 sm:$0xff]  }
  0xc9   :  { %1719 = vmatprep.subr.bf16.mxu0 %v3487_v38  ;;  %1760 = vmatprep.subr.bf16.mxu1 %v3490_v39  ;;  %v3514_v38 = vld [vmem:[#allocation8 + $0x2ac] ss:$16 sps:$4 sm:$0xff]   ;;  %v3509_v39 = vld [vmem:[#allocation8 + $0xa8] ss:$16 sps:$4 sm:$0xff]  }
  0xcc   :  { %1720 = vmatpush2.bf16.msra.mxu0 %v3485_v40  ;;  %1761 = vmatpush2.bf16.msra.mxu1 %v3488_v41  ;;  %v3512_v40 = vld [vmem:[#allocation8 + $0x2a8] ss:$16 sps:$4 sm:$0xff]   ;;  %v3517_v41 = vld [vmem:[#allocation8 + $0x8c] ss:$16 sps:$4 sm:$0xff]  }
  0xcd   :  { %1721 = vmatprep.subr.bf16.mxu0 %v3493_v42  ;;  %1762 = vmatprep.subr.bf16.mxu1 %v3496_v43  ;;  %v3520_v42 = vld [vmem:[#allocation8 + $0x28c] ss:$16 sps:$4 sm:$0xff]   ;;  %v3515_v43 = vld [vmem:[#allocation8 + $0x88] ss:$16 sps:$4 sm:$0xff]  }
  0xd0   :  { %1722 = vmatpush2.bf16.msra.mxu0 %v3491_v44  ;;  %1763 = vmatpush2.bf16.msra.mxu1 %v3494_v45  ;;  %v3518_v44 = vld [vmem:[#allocation8 + $0x288] ss:$16 sps:$4 sm:$0xff]   ;;  %v3523_v45 = vld [vmem:[#allocation8 + $0x6c] ss:$16 sps:$4 sm:$0xff]  }
  0xd1   :  { %1773 = vmatprep.subr.bf16.mxu0 %v3499_v46  ;;  %1814 = vmatprep.subr.bf16.mxu1 %v3502_v47  ;;  %v3526_v46 = vld [vmem:[#allocation8 + $0x26c] ss:$16 sps:$4 sm:$0xff]   ;;  %v3521_v47 = vld [vmem:[#allocation8 + $0x68] ss:$16 sps:$4 sm:$0xff]  }
 0x113   :  { %v388_v48 = vpop.f32.mrf.mxu0  ;;  %v429_v49 = vpop.f32.mrf.mxu1 }
 0x115   :  { %v390_v50 = vpop.f32.mrf.mxu0  ;;  %v431_v51 = vpop.f32.mrf.mxu1 }
 0x117   :  { %v392_v52 = vpop.f32.mrf.mxu0  ;;  %v433_v53 = vpop.f32.mrf.mxu1 }
 0x118   :  { %v3530_v52 = vld [vmem:[#allocation8 + $0x248] ss:$16 sps:$4 sm:$0xff]   ;;  %v3535_v53 = vld [vmem:[#allocation8 + $0x2c] ss:$16 sps:$4 sm:$0xff]  }
 0x119   :  { %v393_v54 = vpop.f32.mrf.mxu0  ;;  %v434_v55 = vpop.f32.mrf.mxu1 }
 0x11a   :  { %v3538_v54 = vld [vmem:[#allocation8 + $0x22c] ss:$16 sps:$4 sm:$0xff]   ;;  %v3533_v55 = vld [vmem:[#allocation8 + $0x28] ss:$16 sps:$4 sm:$0xff]  }
 0x153   :  { %v815_v0 = vpop.f32.mrf.mxu0  ;;  %v856_v1 = vpop.f32.mrf.mxu1 }
 0x154   :  { %v816_v2 = vadd.f32 %v815_v0, %v388_v48  ;;  %v857_v3 = vadd.f32 %v856_v1, %v429_v49  ;;  %v3524_v48 = vld [vmem:[#allocation8 + $0x268] ss:$16 sps:$4 sm:$0xff]   ;;  %v3529_v49 = vld [vmem:[#allocation8 + $0x4c] ss:$16 sps:$4 sm:$0xff]  }
 0x155   :  { %v817_v7 = vpop.f32.mrf.mxu0  ;;  %v858_v8 = vpop.f32.mrf.mxu1  ;;  %v3539_v0 = vld [vmem:[#allocation8 + $0x8] ss:$16 sps:$4 sm:$0xff]  }
 0x156   :  { %v885_v9 = vadd.f32 %v868_v61, %v816_v2  ;;  %v887_v10 = vadd.f32 %v876_v62, %v857_v3  ;;  %v818_v11 = vadd.f32 %v817_v7, %v390_v50  ;;  %v859_v12 = vadd.f32 %v858_v8, %v431_v51  ;;  %v3532_v50 = vld [vmem:[#allocation8 + $0x24c] ss:$16 sps:$4 sm:$0xff]   ;;  %v3527_v51 = vld [vmem:[#allocation8 + $0x48] ss:$16 sps:$4 sm:$0xff]  }
 0x157   :  { %v819_v13 = vpop.f32.mrf.mxu0  ;;  %v860_v14 = vpop.f32.mrf.mxu1  ;;  %v3541_v61 = vld [vmem:[#allocation8 + $0xc] ss:$16 sps:$4 sm:$0xff]   ;;  %v3542_v1 = vld [vmem:[#allocation8 + $0x208] ss:$16 sps:$4 sm:$0xff]  }
 0x158   :  { %v889_v15 = vmul.f32 0.2, %v885_v9  ;;  %v891_v16 = vmul.f32 0.2, %v887_v10  ;;  %v886_v17 = vadd.f32 %v872_v4, %v818_v11  ;;  %v888_v18 = vadd.f32 %v880_v6, %v859_v12  ;;  %v3544_v62 = vld [vmem:[#allocation8 + $0x20c] ss:$16 sps:$4 sm:$0xff]  }
 0x159   :  { %v820_v19 = vpop.f32.mrf.mxu0  ;;  %v861_v20 = vpop.f32.mrf.mxu1  ;;  %v3547_v2 = vld [vmem:[#allocation8 + $0x1ec] ss:$16 sps:$4 sm:$0xff]   ;;  %v3545_v4 = vld [vmem:[#allocation8 + $0x1e8] ss:$16 sps:$4 sm:$0xff]  }
 0x15a   :  { %v890_v21 = vmul.f32 0.2, %v886_v17  ;;  %v892_v22 = vmul.f32 0.2, %v888_v18  ;;  %v893_v23 = vmax.f32 %v885_v9, %v889_v15  ;;  %v895_v24 = vmax.f32 %v887_v10, %v891_v16  ;;  %v3550_v3 = vld [vmem:[#allocation8 + $0x3ec] ss:$16 sps:$4 sm:$0xff]  }
 0x15b   :  { %v3548_v6 = vld [vmem:[#allocation8 + $0x3e8] ss:$16 sps:$4 sm:$0xff]   ;;  %v3553_v7 = vld [vmem:[#allocation8 + $0x1cc] ss:$16 sps:$4 sm:$0xff]  }
 0x15c   :  { %v894_v25 = vmax.f32 %v886_v17, %v890_v21  ;;  %v896_v26 = vmax.f32 %v888_v18, %v892_v22  ;;  %v4019_v31 = vpack.c.bf16 %v893_v23, %v893_v23  ;;  %v4021_v32 = vpack.c.bf16 %v895_v24, %v895_v24  ;;  %v3556_v8 = vld [vmem:[#allocation8 + $0x3cc] ss:$16 sps:$4 sm:$0xff]   ;;  %v3551_v9 = vld [vmem:[#allocation8 + $0x1c8] ss:$16 sps:$4 sm:$0xff]  }
 0x15d   :  { %v3554_v10 = vld [vmem:[#allocation8 + $0x3c8] ss:$16 sps:$4 sm:$0xff]   ;;  %v3559_v11 = vld [vmem:[#allocation8 + $0x1ac] ss:$16 sps:$4 sm:$0xff]  }
 0x15e   :  { %v898_v27 = vpack.c.bf16 %v894_v25, %v894_v25  ;;  %v900_v28 = vpack.c.bf16 %v896_v26, %v896_v26  ;;  %v3562_v12 = vld [vmem:[#allocation8 + $0x3ac] ss:$16 sps:$4 sm:$0xff]   ;;  %v3557_v13 = vld [vmem:[#allocation8 + $0x1a8] ss:$16 sps:$4 sm:$0xff]  }
 0x15f   :  { %v3560_v14 = vld [vmem:[#allocation8 + $0x3a8] ss:$16 sps:$4 sm:$0xff]   ;;  %v3565_v15 = vld [vmem:[#allocation8 + $0x18c] ss:$16 sps:$4 sm:$0xff]  }
 0x160   :  { %1723 = vmatprep.mubr.bf16.mxu0 %v898_v27  ;;  %1764 = vmatprep.mubr.bf16.mxu1 %v900_v28  ;;  %v3568_v16 = vld [vmem:[#allocation8 + $0x38c] ss:$16 sps:$4 sm:$0xff]   ;;  %v3563_v17 = vld [vmem:[#allocation8 + $0x188] ss:$16 sps:$4 sm:$0xff]  }
 0x161   :  { %1724 = vmatmul.mubr.bf16.vlgmr.msra.gmra.mxu0 %v4019_v31  ;;  %1765 = vmatmul.mubr.bf16.vlgmr.msra.gmra.mxu1 %v4021_v32  ;;  %v3566_v18 = vld [vmem:[#allocation8 + $0x388] ss:$16 sps:$4 sm:$0xff]   ;;  %v3571_v19 = vld [vmem:[#allocation8 + $0x16c] ss:$16 sps:$4 sm:$0xff]  }
 0x162   :  { %1774 = vmatpush1.bf16.msra.mxu0 %v3497_v29  ;;  %1815 = vmatpush1.bf16.msra.mxu1 %v3500_v30  ;;  %v3574_v20 = vld [vmem:[#allocation8 + $0x36c] ss:$16 sps:$4 sm:$0xff]   ;;  %v3569_v21 = vld [vmem:[#allocation8 + $0x168] ss:$16 sps:$4 sm:$0xff]  }
 0x163   :  { %1805 = vmatprep.mubr.bf16.mxu0 %v898_v27  ;;  %1846 = vmatprep.mubr.bf16.mxu1 %v900_v28  ;;  %v3572_v22 = vld [vmem:[#allocation8 + $0x368] ss:$16 sps:$4 sm:$0xff]   ;;  %v3577_v23 = vld [vmem:[#allocation8 + $0x14c] ss:$16 sps:$4 sm:$0xff]  }
 0x164   :  { %1775 = vmatprep.subr.bf16.mxu0 %v3505_v33  ;;  %1816 = vmatprep.subr.bf16.mxu1 %v3508_v34  ;;  %v3580_v24 = vld [vmem:[#allocation8 + $0x34c] ss:$16 sps:$4 sm:$0xff]   ;;  %v3575_v25 = vld [vmem:[#allocation8 + $0x148] ss:$16 sps:$4 sm:$0xff]  }
 0x165   :  { %v3578_v26 = vld [vmem:[#allocation8 + $0x348] ss:$16 sps:$4 sm:$0xff]   ;;  %v3583_v27 = vld [vmem:[#allocation8 + $0x12c] ss:$16 sps:$4 sm:$0xff]  }
 0x166   :  { %1776 = vmatpush1.bf16.msra.mxu0 %v3503_v35  ;;  %1817 = vmatpush1.bf16.msra.mxu1 %v3506_v36  ;;  %v3586_v28 = vld [vmem:[#allocation8 + $0x32c] ss:$16 sps:$4 sm:$0xff]   ;;  %v3581_v29 = vld [vmem:[#allocation8 + $0x128] ss:$16 sps:$4 sm:$0xff]  }
 0x167   :  { %1777 = vmatprep.subr.bf16.mxu0 %v3511_v37  ;;  %1818 = vmatprep.subr.bf16.mxu1 %v3514_v38  ;;  %v3584_v30 = vld [vmem:[#allocation8 + $0x328] ss:$16 sps:$4 sm:$0xff]   ;;  %v3589_v33 = vld [vmem:[#allocation8 + $0x10c] ss:$16 sps:$4 sm:$0xff]   ;;  %v3595_v37 = vld [vmem:[#allocation9 + $0xe4] ss:$16 sps:$4 sm:$0xff]  }
 0x168   :  { %v3592_v34 = vld [vmem:[#allocation8 + $0x30c] ss:$16 sps:$4 sm:$0xff]   ;;  %v3587_v35 = vld [vmem:[#allocation8 + $0x108] ss:$16 sps:$4 sm:$0xff]   ;;  %v3593_v38 = vld [vmem:[#allocation9 + $0xe0] ss:$16 sps:$4 sm:$0xff]  }
 0x169   :  { %v3590_v36 = vld [vmem:[#allocation8 + $0x308] ss:$16 sps:$4 sm:$0xff]  }
 0x16a   :  { %1778 = vmatpush1.bf16.msra.mxu0 %v3509_v39  ;;  %1819 = vmatpush1.bf16.msra.mxu1 %v3512_v40  ;;  %v3598_v39 = vld [vmem:[#allocation9 + $0xc4] ss:$16 sps:$4 sm:$0xff]   ;;  %v3596_v40 = vld [vmem:[#allocation9 + $0xc0] ss:$16 sps:$4 sm:$0xff]  }
 0x16b   :  { %1779 = vmatprep.subr.bf16.mxu0 %v3517_v41  ;;  %1820 = vmatprep.subr.bf16.mxu1 %v3520_v42  ;;  %v3601_v41 = vld [vmem:[#allocation9 + $0xa4] ss:$16 sps:$4 sm:$0xff]   ;;  %v3599_v42 = vld [vmem:[#allocation9 + $0xa0] ss:$16 sps:$4 sm:$0xff]  }
 0x16e   :  { %1780 = vmatpush1.bf16.msra.mxu0 %v3515_v43  ;;  %1821 = vmatpush1.bf16.msra.mxu1 %v3518_v44  ;;  %v3604_v43 = vld [vmem:[#allocation9 + $0x84] ss:$16 sps:$4 sm:$0xff]   ;;  %v3602_v44 = vld [vmem:[#allocation9 + $0x80] ss:$16 sps:$4 sm:$0xff]  }
 0x16f   :  { %1781 = vmatprep.subr.bf16.mxu0 %v3523_v45  ;;  %1822 = vmatprep.subr.bf16.mxu1 %v3526_v46  ;;  %v3607_v45 = vld [vmem:[#allocation9 + $0x64] ss:$16 sps:$4 sm:$0xff]   ;;  %v3641_v46 = vld [vmem:[#allocation9 + $0x2e0] ss:$16 sps:$4 sm:$0xff]  }
 0x172   :  { %1782 = vmatpush1.bf16.msra.mxu0 %v3521_v47  ;;  %1823 = vmatpush1.bf16.msra.mxu1 %v3524_v48  ;;  %v3643_v47 = vld [vmem:[#allocation9 + $0x2e4] ss:$16 sps:$4 sm:$0xff]   ;;  %v3605_v48 = vld [vmem:[#allocation9 + $0x60] ss:$16 sps:$4 sm:$0xff]  }
 0x173   :  { %1783 = vmatprep.subr.bf16.mxu0 %v3529_v49  ;;  %1824 = vmatprep.subr.bf16.mxu1 %v3532_v50  ;;  %v3649_v49 = vld [vmem:[#allocation9 + $0x2c4] ss:$16 sps:$4 sm:$0xff]   ;;  %v3608_v50 = vld [vmem:[#allocation9 + $0x40] ss:$16 sps:$4 sm:$0xff]  }
 0x176   :  { %1784 = vmatpush1.bf16.msra.mxu0 %v3527_v51  ;;  %1825 = vmatpush1.bf16.msra.mxu1 %v3530_v52  ;;  %v3613_v51 = vld [vmem:[#allocation9 + $0x24] ss:$16 sps:$4 sm:$0xff]   ;;  %v3653_v52 = vld [vmem:[#allocation9 + $0x2a0] ss:$16 sps:$4 sm:$0xff]  }
 0x177   :  { %1785 = vmatprep.subr.bf16.mxu0 %v3535_v53  ;;  %1826 = vmatprep.subr.bf16.mxu1 %v3538_v54  ;;  %v3655_v53 = vld [vmem:[#allocation9 + $0x2a4] ss:$16 sps:$4 sm:$0xff]   ;;  %v3611_v54 = vld [vmem:[#allocation9 + $0x20] ss:$16 sps:$4 sm:$0xff]  }
 0x17a   :  { %1786 = vmatpush1.bf16.msra.mxu0 %v3533_v55  ;;  %1827 = vmatpush1.bf16.msra.mxu1 %v3536_v58  ;;  %v3616_v55 = vld [vmem:[#allocation9 + $0x4] ss:$16 sps:$4 sm:$0xff]   ;;  %v3659_v58 = vld [vmem:[#allocation9 + $0x280] ss:$16 sps:$4 sm:$0xff]  }
 0x17b   :  { %1787 = vmatprep.subr.bf16.mxu0 %v3541_v61  ;;  %1828 = vmatprep.subr.bf16.mxu1 %v3544_v62  ;;  %v3661_v61 = vld [vmem:[#allocation9 + $0x284] ss:$16 sps:$4 sm:$0xff]   ;;  %v3614_v62 = vld [vmem:[#allocation9] ss:$16 sps:$4 sm:$0xff]  }
 0x17e   :  { %1788 = vmatpush1.bf16.msra.mxu0 %v3539_v0  ;;  %1829 = vmatpush1.bf16.msra.mxu1 %v3542_v1  ;;  %v3619_v0 = vld [vmem:[#allocation9 + $0x1e4] ss:$16 sps:$4 sm:$0xff]   ;;  %v3665_v1 = vld [vmem:[#allocation9 + $0x260] ss:$16 sps:$4 sm:$0xff]  }
 0x17f   :  { %1789 = vmatprep.subr.bf16.mxu0 %v3547_v2  ;;  %1830 = vmatprep.subr.bf16.mxu1 %v3550_v3  ;;  %v3667_v2 = vld [vmem:[#allocation9 + $0x264] ss:$16 sps:$4 sm:$0xff]   ;;  %v3617_v3 = vld [vmem:[#allocation9 + $0x1e0] ss:$16 sps:$4 sm:$0xff]  }
 0x182   :  { %1790 = vmatpush2.bf16.msra.mxu0 %v3545_v4  ;;  %1831 = vmatpush2.bf16.msra.mxu1 %v3548_v6  ;;  %v3622_v4 = vld [vmem:[#allocation9 + $0x1c4] ss:$16 sps:$4 sm:$0xff]   ;;  %v3671_v6 = vld [vmem:[#allocation9 + $0x240] ss:$16 sps:$4 sm:$0xff]  }
 0x183   :  { %1791 = vmatprep.subr.bf16.mxu0 %v3553_v7  ;;  %1832 = vmatprep.subr.bf16.mxu1 %v3556_v8  ;;  %v3673_v7 = vld [vmem:[#allocation9 + $0x244] ss:$16 sps:$4 sm:$0xff]   ;;  %v3620_v8 = vld [vmem:[#allocation9 + $0x1c0] ss:$16 sps:$4 sm:$0xff]  }
 0x186   :  { %1792 = vmatpush2.bf16.msra.mxu0 %v3551_v9  ;;  %1833 = vmatpush2.bf16.msra.mxu1 %v3554_v10  ;;  %v3625_v9 = vld [vmem:[#allocation9 + $0x1a4] ss:$16 sps:$4 sm:$0xff]   ;;  %v3677_v10 = vld [vmem:[#allocation9 + $0x220] ss:$16 sps:$4 sm:$0xff]  }
 0x187   :  { %1793 = vmatprep.subr.bf16.mxu0 %v3559_v11  ;;  %1834 = vmatprep.subr.bf16.mxu1 %v3562_v12  ;;  %v3679_v11 = vld [vmem:[#allocation9 + $0x224] ss:$16 sps:$4 sm:$0xff]   ;;  %v3623_v12 = vld [vmem:[#allocation9 + $0x1a0] ss:$16 sps:$4 sm:$0xff]  }
 0x18a   :  { %1794 = vmatpush2.bf16.msra.mxu0 %v3557_v13  ;;  %1835 = vmatpush2.bf16.msra.mxu1 %v3560_v14  ;;  %v3628_v13 = vld [vmem:[#allocation9 + $0x184] ss:$16 sps:$4 sm:$0xff]   ;;  %v3683_v14 = vld [vmem:[#allocation9 + $0x200] ss:$16 sps:$4 sm:$0xff]  }
 0x18b   :  { %1795 = vmatprep.subr.bf16.mxu0 %v3565_v15  ;;  %1836 = vmatprep.subr.bf16.mxu1 %v3568_v16  ;;  %v3685_v15 = vld [vmem:[#allocation9 + $0x204] ss:$16 sps:$4 sm:$0xff]   ;;  %v3626_v16 = vld [vmem:[#allocation9 + $0x180] ss:$16 sps:$4 sm:$0xff]  }
 0x18e   :  { %1796 = vmatpush2.bf16.msra.mxu0 %v3563_v17  ;;  %1837 = vmatpush2.bf16.msra.mxu1 %v3566_v18  ;;  %v3631_v17 = vld [vmem:[#allocation9 + $0x164] ss:$16 sps:$4 sm:$0xff]   ;;  %v3689_v18 = vld [vmem:[#allocation9 + $0x3e0] ss:$16 sps:$4 sm:$0xff]  }
 0x18f   :  { %1797 = vmatprep.subr.bf16.mxu0 %v3571_v19  ;;  %1838 = vmatprep.subr.bf16.mxu1 %v3574_v20  ;;  %v3691_v19 = vld [vmem:[#allocation9 + $0x3e4] ss:$16 sps:$4 sm:$0xff]   ;;  %v3629_v20 = vld [vmem:[#allocation9 + $0x160] ss:$16 sps:$4 sm:$0xff]  }
 0x192   :  { %1798 = vmatpush2.bf16.msra.mxu0 %v3569_v21  ;;  %1839 = vmatpush2.bf16.msra.mxu1 %v3572_v22  ;;  %v3634_v21 = vld [vmem:[#allocation9 + $0x144] ss:$16 sps:$4 sm:$0xff]   ;;  %v3695_v22 = vld [vmem:[#allocation9 + $0x3c0] ss:$16 sps:$4 sm:$0xff]  }
 0x193   :  { %1799 = vmatprep.subr.bf16.mxu0 %v3577_v23  ;;  %1840 = vmatprep.subr.bf16.mxu1 %v3580_v24  ;;  %v3697_v23 = vld [vmem:[#allocation9 + $0x3c4] ss:$16 sps:$4 sm:$0xff]   ;;  %v3632_v24 = vld [vmem:[#allocation9 + $0x140] ss:$16 sps:$4 sm:$0xff]  }
 0x196   :  { %1800 = vmatpush2.bf16.msra.mxu0 %v3575_v25  ;;  %1841 = vmatpush2.bf16.msra.mxu1 %v3578_v26  ;;  %v3637_v25 = vld [vmem:[#allocation9 + $0x124] ss:$16 sps:$4 sm:$0xff]   ;;  %v3701_v26 = vld [vmem:[#allocation9 + $0x3a0] ss:$16 sps:$4 sm:$0xff]  }
 0x197   :  { %1801 = vmatprep.subr.bf16.mxu0 %v3583_v27  ;;  %1842 = vmatprep.subr.bf16.mxu1 %v3586_v28  ;;  %v3703_v27 = vld [vmem:[#allocation9 + $0x3a4] ss:$16 sps:$4 sm:$0xff]   ;;  %v3635_v28 = vld [vmem:[#allocation9 + $0x120] ss:$16 sps:$4 sm:$0xff]  }
 0x19a   :  { %1802 = vmatpush2.bf16.msra.mxu0 %v3581_v29  ;;  %1843 = vmatpush2.bf16.msra.mxu1 %v3584_v30  ;;  %v3640_v29 = vld [vmem:[#allocation9 + $0x104] ss:$16 sps:$4 sm:$0xff]   ;;  %v3707_v30 = vld [vmem:[#allocation9 + $0x380] ss:$16 sps:$4 sm:$0xff]  }
 0x19b   :  { %1803 = vmatprep.subr.bf16.mxu0 %v3589_v33  ;;  %1844 = vmatprep.subr.bf16.mxu1 %v3592_v34  ;;  %v3709_v33 = vld [vmem:[#allocation9 + $0x384] ss:$16 sps:$4 sm:$0xff]   ;;  %v3638_v34 = vld [vmem:[#allocation9 + $0x100] ss:$16 sps:$4 sm:$0xff]  }
 0x19e   :  { %1804 = vmatpush2.bf16.msra.mxu0 %v3587_v35  ;;  %1845 = vmatpush2.bf16.msra.mxu1 %v3590_v36  ;;  %v3646_v35 = vld [vmem:[#allocation9 + $0xec] ss:$16 sps:$4 sm:$0xff]   ;;  %v3713_v36 = vld [vmem:[#allocation9 + $0x360] ss:$16 sps:$4 sm:$0xff]  }
 0x19f   :  { %2657 = vmatprep.subr.bf16.mxu0 %v3595_v37  ;;  %2698 = vmatprep.subr.bf16.mxu1 %v3643_v47  ;;  %v3715_v37 = vld [vmem:[#allocation9 + $0x364] ss:$16 sps:$4 sm:$0xff]  }
 0x1a1   :  { %1806 = vmatmul.mubr.bf16.vlgmr.msra.gmra.mxu0 %v4019_v31  ;;  %1847 = vmatmul.mubr.bf16.vlgmr.msra.gmra.mxu1 %v4021_v32  ;;  %v3610_v31 = vld [vmem:[#allocation9 + $0x44] ss:$16 sps:$4 sm:$0xff]   ;;  %v3647_v32 = vld [vmem:[#allocation9 + $0x2c0] ss:$16 sps:$4 sm:$0xff]  }
 0x1a2   :  { %2658 = vmatpush1.bf16.msra.mxu0 %v3593_v38  ;;  %2699 = vmatpush1.bf16.msra.mxu1 %v3641_v46  ;;  %v3721_v38 = vld [vmem:[#allocation9 + $0x344] ss:$16 sps:$4 sm:$0xff]  }
 0x1a3   :  { %2659 = vmatprep.subr.bf16.mxu0 %v3598_v39  ;;  %2700 = vmatprep.subr.bf16.mxu1 %v3649_v49  ;;  %v3719_v39 = vld [vmem:[#allocation9 + $0x340] ss:$16 sps:$4 sm:$0xff]  }
 0x1a6   :  { %2660 = vmatpush1.bf16.msra.mxu0 %v3596_v40  ;;  %2701 = vmatpush1.bf16.msra.mxu1 %v3647_v32  ;;  %v3727_v40 = vld [vmem:[#allocation9 + $0x324] ss:$16 sps:$4 sm:$0xff]  }
 0x1a7   :  { %2661 = vmatprep.subr.bf16.mxu0 %v3601_v41  ;;  %2702 = vmatprep.subr.bf16.mxu1 %v3655_v53  ;;  %v3725_v41 = vld [vmem:[#allocation9 + $0x320] ss:$16 sps:$4 sm:$0xff]  }
 0x1aa   :  { %2662 = vmatpush1.bf16.msra.mxu0 %v3599_v42  ;;  %2703 = vmatpush1.bf16.msra.mxu1 %v3653_v52  ;;  %v3733_v42 = vld [vmem:[#allocation9 + $0x304] ss:$16 sps:$4 sm:$0xff]  }
 0x1ab   :  { %2663 = vmatprep.subr.bf16.mxu0 %v3604_v43  ;;  %2704 = vmatprep.subr.bf16.mxu1 %v3661_v61  ;;  %v3731_v43 = vld [vmem:[#allocation9 + $0x300] ss:$16 sps:$4 sm:$0xff]  }
 0x1ae   :  { %2664 = vmatpush1.bf16.msra.mxu0 %v3602_v44  ;;  %2705 = vmatpush1.bf16.msra.mxu1 %v3659_v58  ;;  %v3739_v44 = vld [vmem:[#allocation9 + $0x2ec] ss:$16 sps:$4 sm:$0xff]  }
 0x1af   :  { %2665 = vmatprep.subr.bf16.mxu0 %v3607_v45  ;;  %2706 = vmatprep.subr.bf16.mxu1 %v3667_v2  ;;  %v4030_v45 = vld [vmem:[%s4080_s6] sm:$0xf] }
 0x1b0   :  { %v1034_v46 = vrot.slane %v4030_v45, %v4001_v56  ;;  %v1038_v47 = vrot.slane %v4030_v45, %v4010_v59 }
 0x1b2   :  { %2666 = vmatpush1.bf16.msra.mxu0 %v3605_v48  ;;  %2707 = vmatpush1.bf16.msra.mxu1 %v3665_v1 }
 0x1b3   :  { %2667 = vmatprep.subr.bf16.mxu0 %v3610_v31  ;;  %2708 = vmatprep.subr.bf16.mxu1 %v3673_v7  ;;  %v3652_v7 = vld [vmem:[#allocation9 + $0xcc] ss:$16 sps:$4 sm:$0xff]  }
 0x1b6   :  { %2668 = vmatpush1.bf16.msra.mxu0 %v3608_v50  ;;  %2709 = vmatpush1.bf16.msra.mxu1 %v3671_v6 }
 0x1b7   :  { %2669 = vmatprep.subr.bf16.mxu0 %v3613_v51  ;;  %2710 = vmatprep.subr.bf16.mxu1 %v3679_v11  ;;  %v3664_v11 = vld [vmem:[#allocation9 + $0x8c] ss:$16 sps:$4 sm:$0xff]  }
 0x1ba   :  { %2670 = vmatpush1.bf16.msra.mxu0 %v3611_v54  ;;  %2711 = vmatpush1.bf16.msra.mxu1 %v3677_v10  ;;  %v3656_v10 = vld [vmem:[#allocation9 + $0xa8] ss:$16 sps:$4 sm:$0xff]  }
 0x1bb   :  { %2671 = vmatprep.subr.bf16.mxu0 %v3616_v55  ;;  %2712 = vmatprep.subr.bf16.mxu1 %v3685_v15  ;;  %v3676_v15 = vld [vmem:[#allocation9 + $0x4c] ss:$16 sps:$4 sm:$0xff]  }
 0x1be   :  { %2672 = vmatpush1.bf16.msra.mxu0 %v3614_v62  ;;  %2713 = vmatpush1.bf16.msra.mxu1 %v3683_v14  ;;  %v3668_v14 = vld [vmem:[#allocation9 + $0x68] ss:$16 sps:$4 sm:$0xff]  }
 0x1bf   :  { %2673 = vmatprep.subr.bf16.mxu0 %v3619_v0  ;;  %2714 = vmatprep.subr.bf16.mxu1 %v3691_v19  ;;  %v3688_v19 = vld [vmem:[#allocation9 + $0xc] ss:$16 sps:$4 sm:$0xff]  }
 0x1c2   :  { %2674 = vmatpush2.bf16.msra.mxu0 %v3617_v3  ;;  %2715 = vmatpush2.bf16.msra.mxu1 %v3689_v18  ;;  %v3680_v18 = vld [vmem:[#allocation9 + $0x28] ss:$16 sps:$4 sm:$0xff]  }
 0x1c3   :  { %2675 = vmatprep.subr.bf16.mxu0 %v3622_v4  ;;  %2716 = vmatprep.subr.bf16.mxu1 %v3697_v23  ;;  %v3644_v4 = vld [vmem:[#allocation9 + $0xe8] ss:$16 sps:$4 sm:$0xff]   ;;  %v3700_v23 = vld [vmem:[#allocation9 + $0x1cc] ss:$16 sps:$4 sm:$0xff]  }
 0x1c6   :  { %2676 = vmatpush2.bf16.msra.mxu0 %v3620_v8  ;;  %2717 = vmatpush2.bf16.msra.mxu1 %v3695_v22  ;;  %v3650_v8 = vld [vmem:[#allocation9 + $0xc8] ss:$16 sps:$4 sm:$0xff]  }
 0x1c7   :  { %2677 = vmatprep.subr.bf16.mxu0 %v3625_v9  ;;  %2718 = vmatprep.subr.bf16.mxu1 %v3703_v27  ;;  %v3658_v9 = vld [vmem:[#allocation9 + $0xac] ss:$16 sps:$4 sm:$0xff]   ;;  %v3692_v22 = vld [vmem:[#allocation9 + $0x1e8] ss:$16 sps:$4 sm:$0xff]  }
 0x1c8   :  { %v3712_v27 = vld [vmem:[#allocation9 + $0x18c] ss:$16 sps:$4 sm:$0xff]  }
 0x1ca   :  { %2678 = vmatpush2.bf16.msra.mxu0 %v3623_v12  ;;  %2719 = vmatpush2.bf16.msra.mxu1 %v3701_v26  ;;  %v3662_v12 = vld [vmem:[#allocation9 + $0x88] ss:$16 sps:$4 sm:$0xff]  }
 0x1cb   :  { %2679 = vmatprep.subr.bf16.mxu0 %v3628_v13  ;;  %2720 = vmatprep.subr.bf16.mxu1 %v3709_v33  ;;  %v3670_v13 = vld [vmem:[#allocation9 + $0x6c] ss:$16 sps:$4 sm:$0xff]   ;;  %v3704_v26 = vld [vmem:[#allocation9 + $0x1a8] ss:$16 sps:$4 sm:$0xff]  }
 0x1cc   :  { %v3724_v33 = vld [vmem:[#allocation9 + $0x14c] ss:$16 sps:$4 sm:$0xff]  }
 0x1ce   :  { %2680 = vmatpush2.bf16.msra.mxu0 %v3626_v16  ;;  %2721 = vmatpush2.bf16.msra.mxu1 %v3707_v30  ;;  %v3674_v16 = vld [vmem:[#allocation9 + $0x48] ss:$16 sps:$4 sm:$0xff]  }
 0x1cf   :  { %2681 = vmatprep.subr.bf16.mxu0 %v3631_v17  ;;  %2722 = vmatprep.subr.bf16.mxu1 %v3715_v37  ;;  %v3682_v17 = vld [vmem:[#allocation9 + $0x2c] ss:$16 sps:$4 sm:$0xff]   ;;  %v3716_v30 = vld [vmem:[#allocation9 + $0x168] ss:$16 sps:$4 sm:$0xff]  }
 0x1d2   :  { %2682 = vmatpush2.bf16.msra.mxu0 %v3629_v20  ;;  %2723 = vmatpush2.bf16.msra.mxu1 %v3713_v36  ;;  %v3686_v20 = vld [vmem:[#allocation9 + $0x8] ss:$16 sps:$4 sm:$0xff]  }
 0x1d3   :  { %2683 = vmatprep.subr.bf16.mxu0 %v3634_v21  ;;  %2724 = vmatprep.subr.bf16.mxu1 %v3721_v38  ;;  %v3694_v21 = vld [vmem:[#allocation9 + $0x1ec] ss:$16 sps:$4 sm:$0xff]   ;;  %v3722_v36 = vld [vmem:[#allocation9 + $0x148] ss:$16 sps:$4 sm:$0xff]  }
 0x1d6   :  { %2684 = vmatpush2.bf16.msra.mxu0 %v3632_v24  ;;  %2725 = vmatpush2.bf16.msra.mxu1 %v3719_v39  ;;  %v3698_v24 = vld [vmem:[#allocation9 + $0x1c8] ss:$16 sps:$4 sm:$0xff]   ;;  %v3730_v39 = vld [vmem:[#allocation9 + $0x12c] ss:$16 sps:$4 sm:$0xff]  }
 0x1d7   :  { %2685 = vmatprep.subr.bf16.mxu0 %v3637_v25  ;;  %2726 = vmatprep.subr.bf16.mxu1 %v3727_v40  ;;  %v3706_v25 = vld [vmem:[#allocation9 + $0x1ac] ss:$16 sps:$4 sm:$0xff]  }
 0x1da   :  { %2686 = vmatpush2.bf16.msra.mxu0 %v3635_v28  ;;  %2727 = vmatpush2.bf16.msra.mxu1 %v3725_v41  ;;  %v3710_v28 = vld [vmem:[#allocation9 + $0x188] ss:$16 sps:$4 sm:$0xff]  }
 0x1db   :  { %2687 = vmatprep.subr.bf16.mxu0 %v3640_v29  ;;  %2728 = vmatprep.subr.bf16.mxu1 %v3733_v42  ;;  %v3718_v29 = vld [vmem:[#allocation9 + $0x16c] ss:$16 sps:$4 sm:$0xff]  }
 0x1de   :  { %2688 = vmatpush2.bf16.msra.mxu0 %v3638_v34  ;;  %2729 = vmatpush2.bf16.msra.mxu1 %v3731_v43  ;;  %v1042_v34 = vrot.slane %v4030_v45, %v4004_v57 }
 0x1df   :  { %2739 = vmatprep.subr.bf16.mxu0 %v3646_v35  ;;  %2780 = vmatprep.subr.bf16.mxu1 %v3739_v44  ;;  %v1046_v35 = vrot.slane %v4030_v45, %v4013_v60 }
 0x221   :  { %v1725_v48 = vpop.f32.mrf.mxu0  ;;  %v1766_v31 = vpop.f32.mrf.mxu1 }
 0x222   :  { %v1726_v32 = vadd.f32 %v1725_v48, %v1034_v46  ;;  %v3728_v46 = vld [vmem:[#allocation9 + $0x128] ss:$16 sps:$4 sm:$0xff]  }
 0x223   :  { %v1727_v49 = vpop.f32.mrf.mxu0  ;;  %v1768_v50 = vpop.f32.mrf.mxu1 }
 0x224   :  { %v1767_v51 = vadd.f32 %v1766_v31, %v1726_v32  ;;  %v1728_v52 = vadd.f32 %v1727_v49, %v1038_v47  ;;  %v3736_v31 = vld [vmem:[#allocation9 + $0x10c] ss:$16 sps:$4 sm:$0xff]  }
 0x225   :  { %v1729_v53 = vpop.f32.mrf.mxu0  ;;  %v1770_v54 = vpop.f32.mrf.mxu1 }
 0x226   :  { %v1855_v55 = vmul.f32 0.2, %v1767_v51  ;;  %v1769_v58 = vadd.f32 %v1768_v50, %v1728_v52  ;;  %v3734_v52 = vld [vmem:[#allocation9 + $0x108] ss:$16 sps:$4 sm:$0xff]  }
 0x227   :  { %v1730_v61 = vpop.f32.mrf.mxu0  ;;  %v1771_v62 = vpop.f32.mrf.mxu1 }
 0x228   :  { %v1856_v0 = vmul.f32 0.2, %v1769_v58  ;;  %v1859_v1 = vmax.f32 %v1767_v51, %v1855_v55  ;;  %v3742_v62 = vld [vmem:[#allocation9 + $0x2cc] ss:$16 sps:$4 sm:$0xff]  }
 0x22a   :  { %v1860_v2 = vmax.f32 %v1769_v58, %v1856_v0  ;;  %v4036_v6 = vpack.c.bf16 %v1859_v1, %v1859_v1  ;;  %v3737_v58 = vld [vmem:[#allocation9 + $0x2e8] ss:$16 sps:$4 sm:$0xff]   ;;  %v3745_v1 = vld [vmem:[#allocation9 + $0x2ac] ss:$16 sps:$4 sm:$0xff]  }
 0x22b   :  { %v3740_v0 = vld [vmem:[#allocation9 + $0x2c8] ss:$16 sps:$4 sm:$0xff]  }
 0x22c   :  { %v1864_v3 = vpack.c.bf16 %v1860_v2, %v1860_v2  ;;  %v3743_v2 = vld [vmem:[#allocation9 + $0x2a8] ss:$16 sps:$4 sm:$0xff]  }
 0x22e   :  { %2689 = vmatprep.mubr.bf16.mxu0 %v1864_v3 }
 0x22f   :  { %2690 = vmatmul.mubr.bf16.vlgmr.msra.gmra.mxu0 %v4036_v6 }
 0x230   :  { %2740 = vmatpush1.bf16.msra.mxu0 %v3644_v4  ;;  %2771 = vmatprep.mubr.bf16.mxu0 %v1864_v3  ;;  %v3748_v3 = vld [vmem:[#allocation9 + $0x28c] ss:$16 sps:$4 sm:$0xff]   ;;  %v3746_v4 = vld [vmem:[#allocation9 + $0x288] ss:$16 sps:$4 sm:$0xff]  }
 0x231   :  { %2741 = vmatprep.subr.bf16.mxu0 %v3652_v7  ;;  %v3751_v7 = vld [vmem:[#allocation9 + $0x26c] ss:$16 sps:$4 sm:$0xff]  }
 0x234   :  { %2742 = vmatpush1.bf16.msra.mxu0 %v3650_v8  ;;  %v3749_v8 = vld [vmem:[#allocation9 + $0x268] ss:$16 sps:$4 sm:$0xff]  }
 0x235   :  { %2743 = vmatprep.subr.bf16.mxu0 %v3658_v9  ;;  %v3754_v9 = vld [vmem:[#allocation9 + $0x24c] ss:$16 sps:$4 sm:$0xff]  }
 0x238   :  { %2744 = vmatpush1.bf16.msra.mxu0 %v3656_v10  ;;  %v3752_v10 = vld [vmem:[#allocation9 + $0x248] ss:$16 sps:$4 sm:$0xff]  }
 0x239   :  { %2745 = vmatprep.subr.bf16.mxu0 %v3664_v11  ;;  %v3755_v11 = vld [vmem:[#allocation9 + $0x228] ss:$16 sps:$4 sm:$0xff]  }
 0x23c   :  { %2746 = vmatpush1.bf16.msra.mxu0 %v3662_v12  ;;  %v3760_v12 = vld [vmem:[#allocation9 + $0x20c] ss:$16 sps:$4 sm:$0xff]  }
 0x23d   :  { %2747 = vmatprep.subr.bf16.mxu0 %v3670_v13  ;;  %v3758_v13 = vld [vmem:[#allocation9 + $0x208] ss:$16 sps:$4 sm:$0xff]  }
 0x240   :  { %2748 = vmatpush1.bf16.msra.mxu0 %v3668_v14  ;;  %v3763_v14 = vld [vmem:[#allocation9 + $0x3ec] ss:$16 sps:$4 sm:$0xff]  }
 0x241   :  { %2749 = vmatprep.subr.bf16.mxu0 %v3676_v15  ;;  %v3761_v15 = vld [vmem:[#allocation9 + $0x3e8] ss:$16 sps:$4 sm:$0xff]  }
 0x244   :  { %2750 = vmatpush1.bf16.msra.mxu0 %v3674_v16  ;;  %v3766_v16 = vld [vmem:[#allocation9 + $0x3cc] ss:$16 sps:$4 sm:$0xff]  }
 0x245   :  { %2751 = vmatprep.subr.bf16.mxu0 %v3682_v17  ;;  %v3764_v17 = vld [vmem:[#allocation9 + $0x3c8] ss:$16 sps:$4 sm:$0xff]  }
 0x248   :  { %2752 = vmatpush1.bf16.msra.mxu0 %v3680_v18  ;;  %v3769_v18 = vld [vmem:[#allocation9 + $0x3ac] ss:$16 sps:$4 sm:$0xff]  }
 0x249   :  { %2753 = vmatprep.subr.bf16.mxu0 %v3688_v19  ;;  %v3767_v19 = vld [vmem:[#allocation9 + $0x3a8] ss:$16 sps:$4 sm:$0xff]  }
 0x24c   :  { %2754 = vmatpush1.bf16.msra.mxu0 %v3686_v20  ;;  %v3772_v20 = vld [vmem:[#allocation9 + $0x38c] ss:$16 sps:$4 sm:$0xff]  }
 0x24d   :  { %2755 = vmatprep.subr.bf16.mxu0 %v3694_v21  ;;  %v3770_v21 = vld [vmem:[#allocation9 + $0x388] ss:$16 sps:$4 sm:$0xff]  }
 0x250   :  { %2756 = vmatpush2.bf16.msra.mxu0 %v3692_v22  ;;  %v3775_v22 = vld [vmem:[#allocation9 + $0x36c] ss:$16 sps:$4 sm:$0xff]  }
 0x251   :  { %2757 = vmatprep.subr.bf16.mxu0 %v3700_v23  ;;  %v3773_v23 = vld [vmem:[#allocation9 + $0x368] ss:$16 sps:$4 sm:$0xff]  }
 0x254   :  { %2758 = vmatpush2.bf16.msra.mxu0 %v3698_v24  ;;  %v3778_v24 = vld [vmem:[#allocation9 + $0x34c] ss:$16 sps:$4 sm:$0xff]  }
 0x255   :  { %2759 = vmatprep.subr.bf16.mxu0 %v3706_v25  ;;  %v3776_v25 = vld [vmem:[#allocation9 + $0x348] ss:$16 sps:$4 sm:$0xff]  }
 0x258   :  { %2760 = vmatpush2.bf16.msra.mxu0 %v3704_v26  ;;  %v3781_v26 = vld [vmem:[#allocation9 + $0x32c] ss:$16 sps:$4 sm:$0xff]  }
 0x259   :  { %2761 = vmatprep.subr.bf16.mxu0 %v3712_v27  ;;  %v3779_v27 = vld [vmem:[#allocation9 + $0x328] ss:$16 sps:$4 sm:$0xff]  }
 0x25c   :  { %2762 = vmatpush2.bf16.msra.mxu0 %v3710_v28  ;;  %v3784_v28 = vld [vmem:[#allocation9 + $0x30c] ss:$16 sps:$4 sm:$0xff]  }
 0x25d   :  { %2763 = vmatprep.subr.bf16.mxu0 %v3718_v29  ;;  %v3782_v29 = vld [vmem:[#allocation9 + $0x308] ss:$16 sps:$4 sm:$0xff]  }
 0x260   :  { %2764 = vmatpush2.bf16.msra.mxu0 %v3716_v30 }
 0x261   :  { %v1807_v37 = vpop.f32.mrf.mxu0  ;;  %v1848_v38 = vpop.f32.mrf.mxu1  ;;  %2765 = vmatprep.subr.bf16.mxu0 %v3724_v33 }
 0x262   :  { %v1808_v40 = vadd.f32 %v1807_v37, %v1042_v34 }
 0x263   :  { %v1809_v41 = vpop.f32.mrf.mxu0  ;;  %v1850_v42 = vpop.f32.mrf.mxu1 }
 0x264   :  { %v1849_v43 = vadd.f32 %v1848_v38, %v1808_v40  ;;  %v1810_v44 = vadd.f32 %v1809_v41, %v1046_v35  ;;  %2766 = vmatpush2.bf16.msra.mxu0 %v3722_v36  ;;  %v1995_v36 = vld [vmem:[%s4082_s8] sm:$0xf] }
 0x265   :  { %v1811_v47 = vpop.f32.mrf.mxu0  ;;  %v1852_v48 = vpop.f32.mrf.mxu1  ;;  %2767 = vmatprep.subr.bf16.mxu0 %v3730_v39  ;;  %v2000_v37 = vrot.slane %v1995_v36, %v4001_v56  ;;  %v2004_v38 = vrot.slane %v1995_v36, %v4010_v59  ;;  %v2829_v41 = vld [vmem:[%s4083_s9] sm:$0xf] }
 0x266   :  { %v1857_v32 = vmul.f32 0.2, %v1849_v43  ;;  %v1851_v49 = vadd.f32 %v1850_v42, %v1810_v44 }
 0x267   :  { %v1812_v50 = vpop.f32.mrf.mxu0  ;;  %v1853_v45 = vpop.f32.mrf.mxu1 }
 0x268   :  { %v1858_v51 = vmul.f32 0.2, %v1851_v49  ;;  %2768 = vmatpush2.bf16.msra.mxu0 %v3728_v46  ;;  %v1861_v53 = vmax.f32 %v1849_v43, %v1857_v32 }
 0x269   :  { %2769 = vmatprep.subr.bf16.mxu0 %v3736_v31  ;;  %v2834_v31 = vrot.slane %v2829_v41, %v4001_v56  ;;  %v2008_v56 = vrot.slane %v1995_v36, %v4004_v57 }
 0x26a   :  { %v1862_v54 = vmax.f32 %v1851_v49, %v1858_v51  ;;  %v4043_v61 = vpack.c.bf16 %v1861_v53, %v1861_v53 }
 0x26c   :  { %v1866_v55 = vpack.c.bf16 %v1862_v54, %v1862_v54  ;;  %2770 = vmatpush2.bf16.msra.mxu0 %v3734_v52  ;;  %v2838_v52 = vrot.slane %v2829_v41, %v4010_v59 }
 0x26e   :  { %2730 = vmatprep.mubr.bf16.mxu1 %v1866_v55 }
 0x26f   :  { %2731 = vmatmul.mubr.bf16.vlgmr.msra.gmra.mxu1 %v4043_v61  ;;  %2772 = vmatmul.mubr.bf16.vlgmr.msra.gmra.mxu0 %v4036_v6  ;;  %v3757_v6 = vld [vmem:[#allocation9 + $0x22c] ss:$16 sps:$4 sm:$0xff]  }
 0x270   :  { %2781 = vmatpush1.bf16.msra.mxu1 %v3737_v58  ;;  %2812 = vmatprep.mubr.bf16.mxu1 %v1866_v55 }
 0x271   :  { %2782 = vmatprep.subr.bf16.mxu1 %v3742_v62 }
 0x274   :  { %2783 = vmatpush1.bf16.msra.mxu1 %v3740_v0 }
 0x275   :  { %2784 = vmatprep.subr.bf16.mxu1 %v3745_v1 }
 0x278   :  { %2785 = vmatpush1.bf16.msra.mxu1 %v3743_v2  ;;  %v2012_v2 = vrot.slane %v1995_v36, %v4013_v60 }
 0x279   :  { %2786 = vmatprep.subr.bf16.mxu1 %v3748_v3 }
 0x27c   :  { %2787 = vmatpush1.bf16.msra.mxu1 %v3746_v4 }
 0x27d   :  { %2788 = vmatprep.subr.bf16.mxu1 %v3751_v7 }
 0x280   :  { %2789 = vmatpush1.bf16.msra.mxu1 %v3749_v8 }
 0x281   :  { %2790 = vmatprep.subr.bf16.mxu1 %v3754_v9 }
 0x284   :  { %2791 = vmatpush1.bf16.msra.mxu1 %v3752_v10  ;;  %v2842_v10 = vrot.slane %v2829_v41, %v4004_v57  ;;  %v2866_v57 = vstv %s4084_s10 }
 0x285   :  { %2792 = vmatprep.subr.bf16.mxu1 %v3757_v6 }
 0x288   :  { %2793 = vmatpush1.bf16.msra.mxu1 %v3755_v11 }
 0x289   :  { %2794 = vmatprep.subr.bf16.mxu1 %v3760_v12 }
 0x28c   :  { %2795 = vmatpush1.bf16.msra.mxu1 %v3758_v13 }
 0x28d   :  { %2796 = vmatprep.subr.bf16.mxu1 %v3763_v14  ;;  %v2846_v14 = vrot.slane %v2829_v41, %v4013_v60 }
 0x290   :  { %2797 = vmatpush2.bf16.msra.mxu1 %v3761_v15 }
 0x291   :  { %2798 = vmatprep.subr.bf16.mxu1 %v3766_v16 }
 0x294   :  { %2799 = vmatpush2.bf16.msra.mxu1 %v3764_v17 }
 0x295   :  { %2800 = vmatprep.subr.bf16.mxu1 %v3769_v18 }
 0x298   :  { %2801 = vmatpush2.bf16.msra.mxu1 %v3767_v19 }
 0x299   :  { %2802 = vmatprep.subr.bf16.mxu1 %v3772_v20 }
 0x29c   :  { %2803 = vmatpush2.bf16.msra.mxu1 %v3770_v21 }
 0x29d   :  { %2804 = vmatprep.subr.bf16.mxu1 %v3775_v22 }
 0x2a0   :  { %2805 = vmatpush2.bf16.msra.mxu1 %v3773_v23  ;;  %v2870_v23 = vand.u32 127, %v448_v63 }
 0x2a1   :  { %2806 = vmatprep.subr.bf16.mxu1 %v3778_v24 }
 0x2a2   :  { %v2873_v24 = vsub.s32 %v2870_v23, %v3990_v5 }
 0x2a4   :  { %2807 = vmatpush2.bf16.msra.mxu1 %v3776_v25 }
 0x2a5   :  { %2808 = vmatprep.subr.bf16.mxu1 %v3781_v26 }
 0x2a8   :  { %2809 = vmatpush2.bf16.msra.mxu1 %v3779_v27 }
 0x2a9   :  { %2810 = vmatprep.subr.bf16.mxu1 %v3784_v28 }
 0x2ac   :  { %2811 = vmatpush2.bf16.msra.mxu1 %v3782_v29 }
 0x2af   :  { %2813 = vmatmul.mubr.bf16.vlgmr.msra.gmra.mxu1 %v4043_v61 }
 0x2ef   :  { %v2691_v30 = vpop.f32.mrf.mxu0 }
 0x2f0   :  { %v2692_v39 = vadd.f32 %v2691_v30, %v2000_v37 }
 0x2f1   :  { %v2693_v33 = vpop.f32.mrf.mxu0 }
 0x2f2   :  { %v2694_v43 = vadd.f32 %v2693_v33, %v2004_v38 }
 0x2f3   :  { %v2695_v34 = vpop.f32.mrf.mxu0 }
 0x2f5   :  { %v2696_v35 = vpop.f32.mrf.mxu0 }
 0x32f   :  { %v2732_v40 = vpop.f32.mrf.mxu1  ;;  %v2773_v42 = vpop.f32.mrf.mxu0 }
 0x330   :  { %v2733_v44 = vadd.f32 %v2732_v40, %v2692_v39  ;;  %v2774_v3 = vadd.f32 %v2773_v42, %v2008_v56 }
 0x331   :  { %v2734_v46 = vpop.f32.mrf.mxu1  ;;  %v2775_v47 = vpop.f32.mrf.mxu0 }
 0x332   :  { %v2821_v48 = vmul.f32 0.2, %v2733_v44  ;;  %v2735_v32 = vadd.f32 %v2734_v46, %v2694_v43  ;;  %v2776_v7 = vadd.f32 %v2775_v47, %v2012_v2 }
 0x333   :  { %v2736_v49 = vpop.f32.mrf.mxu1  ;;  %v2777_v50 = vpop.f32.mrf.mxu0 }
 0x334   :  { %v2825_v45 = vmax.f32 %v2733_v44, %v2821_v48  ;;  %v2822_v51 = vmul.f32 0.2, %v2735_v32 }
 0x335   :  { %v2737_v53 = vpop.f32.mrf.mxu1  ;;  %v2778_v54 = vpop.f32.mrf.mxu0 }
 0x336   :  { %v2851_v55 = vmul.f32 %v2834_v31, %v2825_v45  ;;  %v2826_v58 = vmax.f32 %v2735_v32, %v2822_v51 }
 0x338   :  { %v2852_v61 = vmul.f32 %v2838_v52, %v2826_v58  ;;  %v2856_v62 = vsel %vm2855_vm0, %v2851_v55, 0.0 }
 0x33a   :  { %v2857_v0 = vsel %vm2855_vm0, %v2852_v61, 0.0 }
 0x33b   :  { %v2858_v1 = vadd.f32 %v2857_v0, %v2856_v62 }
 0x36f   :  { %v2814_v4 = vpop.f32.mrf.mxu1 }
 0x370   :  { %v2815_v8 = vadd.f32 %v2814_v4, %v2774_v3 }
 0x371   :  { %v2816_v59 = vpop.f32.mrf.mxu1 }
 0x372   :  { %v2823_v9 = vmul.f32 0.2, %v2815_v8  ;;  %v2817_v6 = vadd.f32 %v2816_v59, %v2776_v7 }
 0x373   :  { %v2818_v11 = vpop.f32.mrf.mxu1 }
 0x374   :  { %v2827_v12 = vmax.f32 %v2815_v8, %v2823_v9  ;;  %v2824_v13 = vmul.f32 0.2, %v2817_v6 }
 0x375   :  { %v2819_v15 = vpop.f32.mrf.mxu1 }
 0x376   :  { %v2853_v16 = vmul.f32 %v2842_v10, %v2827_v12  ;;  %v2828_v17 = vmax.f32 %v2817_v6, %v2824_v13 }
 0x378   :  { %v2854_v18 = vmul.f32 %v2846_v14, %v2828_v17  ;;  %v2859_v19 = vsel %vm2855_vm0, %v2853_v16, 0.0 }
 0x379   :  { %v2860_v20 = vadd.f32 %v2859_v19, %v2858_v1 }
 0x37a   :  { %v2861_v21 = vsel %vm2855_vm0, %v2854_v18, 0.0 }
 0x37b   :  { %v2862_v22 = vadd.f32 %v2861_v21, %v2860_v20 }
 0x37d   :  { %2863 = vadd.xlane.f32.xlu0 %v2862_v22 }
 0x406   :  { %v2864_v60 = vpop.xlane.xlu0 %2863 }
 0x407   :  { %v2867_v25 = vadd.f32 %v2866_v57, %v2864_v60 }
 0x409   :  { %v2874_v26 = vrot.slane %v2867_v25, %v2873_v24 }
 0x40b   :  { %2877 = vst.msk [vmem:[#allocation11] sm:$0x1] %vm2876_vm1, %v2874_v26 }
 0x40c   :  { %3876 = shalt.err (!%p3873_p10)
}
 0x40d   :  { %2887 = dma.vmem_to_hbm [thread:$0]  %s2885_s25, 16, %s4085_s11, [#allocation5]  }
 0x40e   :  { %3891 = dma.done.wait [#allocation5], 16  }
 0x40f   :  { %3892 = vsyncadd [#allocation5], 4294967280 }
 0x410   :  { %2891 = vsyncpa [#allocation4], 1 }
 0x411   :  { %2892 = vsyncpa [#allocation7], 1 }
 0x412   :  { %2893 = vsyncpa [#allocation10], 1 }
 0x413   :  { %2894 = vsyncpa [#allocation5], 1 }

</bundles_post_ra>
